<compile_context>
chip_gen: v7x
topology: tpu7x:2x2x1
jax: 0.10.0
libtpu: 0.0.40
codegen_flags: <defaults>
</compile_context>

<pallas_src>
import functools

import jax
import jax.numpy as jnp
from jax.experimental import pallas as pl
from jax.experimental.pallas import tpu as pltpu

Dimension = 128
NCluster = 100
scale = 1.0

H1 = int(1024 * scale)
H2 = int(512 * scale)
H3 = int(256 * scale)
NC_PAD = 128  # fc4 output padded to a full 128-lane width (lane-dense stores)

_TB_BUCKETS = (8, 128, 256, 512)


def _mlp_kernel(x_ref,
                w1_ref, b1_ref,
                w2_ref, b2_ref,
                w3_ref, b3_ref,
                w4_ref, b4_ref,
                o_ref):
    # Input arrives as f32 and is narrowed to bf16 here (no wrapper-side cast).
    x = x_ref[...].astype(jnp.bfloat16)

    h = jnp.dot(x, w1_ref[...], preferred_element_type=jnp.float32) + b1_ref[...]
    h = jnp.maximum(h, 0.0).astype(jnp.bfloat16)

    h = jnp.dot(h, w2_ref[...], preferred_element_type=jnp.float32) + b2_ref[...]
    h = jnp.maximum(h, 0.0).astype(jnp.bfloat16)

    h = jnp.dot(h, w3_ref[...], preferred_element_type=jnp.float32) + b3_ref[...]
    h = jnp.maximum(h, 0.0).astype(jnp.bfloat16)

    o_ref[...] = jnp.dot(h, w4_ref[...], preferred_element_type=jnp.float32) + b4_ref[...]


def _round_up(n, m):
    return ((n + m - 1) // m) * m


def _choose_tb(batch):
    """Bucketed batch tile: 8 for tiny batches, otherwise the smallest of
    {128, 256, 512} covering the batch (single grid step up to B=512, so the
    weight fetch is never duplicated across v7x cores for small batches);
    B > 512 uses TB=512 with multiple 'parallel' grid steps."""
    b8 = _round_up(max(batch, 1), 8)
    for tb in _TB_BUCKETS:
        if b8 <= tb:
            return tb
    return _TB_BUCKETS[-1]


def _vmem_limit_bytes(tb):
    """Right-size the scoped VMEM request from the actual tile footprint."""
    weight_bytes = 2 * (Dimension * H1 + H1 * H2 + H2 * H3 + H3 * NC_PAD)  # bf16
    bias_bytes = 4 * (H1 + H2 + H3 + NC_PAD)                               # f32
    io_bytes = tb * (Dimension + NC_PAD) * 4                               # f32 tiles
    # Intermediate activations: f32 accumulators + bf16 re-narrowed copies.
    scratch_bytes = tb * (H1 + H2 + H3) * (4 + 2)
    # Inputs/outputs are double buffered by the pipeline.
    total = 2 * (weight_bytes + bias_bytes + io_bytes) + scratch_bytes
    # Generous safety margin for compiler-internal copies / relayouts.
    return int(min(64 * 1024 * 1024, 2 * total + 4 * 1024 * 1024))


@functools.partial(jax.jit, static_argnames=("tb",))
def _forward_impl(x, p, tb):
    B = x.shape[0]
    B_pad = _round_up(B, tb)
    if B_pad != B:
        x = jnp.pad(x, ((0, B_pad - B), (0, 0)))  # f32 pad only; cast is in-kernel

    grid = (B_pad // tb,)
    full = lambda shape: pl.BlockSpec(shape, lambda i: (0, 0))

    out = pl.pallas_call(
        _mlp_kernel,
        out_shape=jax.ShapeDtypeStruct((B_pad, NC_PAD), jnp.float32),
        grid_spec=pl.GridSpec(
            grid=grid,
            in_specs=[
                pl.BlockSpec((tb, Dimension), lambda i: (i, 0)),   # x tile (f32)
                full((Dimension, H1)), full((1, H1)),              # fc1
                full((H1, H2)),        full((1, H2)),              # fc2
                full((H2, H3)),        full((1, H3)),              # fc3
                full((H3, NC_PAD)),    full((1, NC_PAD)),          # fc4 (lane-padded)
            ],
            out_specs=pl.BlockSpec((tb, NC_PAD), lambda i: (i, 0)),
        ),
        compiler_params=pltpu.CompilerParams(
            dimension_semantics=("parallel",),
            vmem_limit_bytes=_vmem_limit_bytes(tb),
        ),
    )(x, p["w1"], p["b1"], p["w2"], p["b2"], p["w3"], p["b3"], p["w4"], p["b4"])

    return out[:B, :NCluster]


def fully_connected_net(x, prepared_params):
    """x: (B, 128) float32.  prepared_params: output of prepare_params()."""
    B, D = x.shape
    assert D == Dimension
    tb = _choose_tb(B)
    return _forward_impl(x, prepared_params, tb=tb)


def init_params(key):
    """Deterministic PyTorch-Linear-style init (uniform +/- 1/sqrt(fan_in)),
    weights stored as (in_features, out_features), float32."""
    def linear(key, fan_in, fan_out):
        kw, kb = jax.random.split(key)
        bound = 1.0 / jnp.sqrt(float(fan_in))
        w = jax.random.uniform(kw, (fan_in, fan_out), jnp.float32, -bound, bound)
        b = jax.random.uniform(kb, (1, fan_out), jnp.float32, -bound, bound)
        return w, b

    k1, k2, k3, k4 = jax.random.split(key, 4)
    w1, b1 = linear(k1, Dimension, H1)
    w2, b2 = linear(k2, H1, H2)
    w3, b3 = linear(k3, H2, H3)
    w4, b4 = linear(k4, H3, NCluster)
    return {"w1": w1, "b1": b1, "w2": w2, "b2": b2,
            "w3": w3, "b3": b3, "w4": w4, "b4": b4}


def prepare_params(params):
    """One-time conversion for the kernel: weights -> bf16, biases stay f32,
    fc4 zero-padded from 100 to 128 output lanes."""
    pad = NC_PAD - NCluster
    w4p = jnp.pad(params["w4"], ((0, 0), (0, pad)))
    b4p = jnp.pad(params["b4"], ((0, 0), (0, pad)))
    return {
        "w1": params["w1"].astype(jnp.bfloat16), "b1": params["b1"].astype(jnp.float32),
        "w2": params["w2"].astype(jnp.bfloat16), "b2": params["b2"].astype(jnp.float32),
        "w3": params["w3"].astype(jnp.bfloat16), "b3": params["b3"].astype(jnp.float32),
        "w4": w4p.astype(jnp.bfloat16),          "b4": b4p.astype(jnp.float32),
    }


def _reference(x, p):
    h = jax.nn.relu(x @ p["w1"] + p["b1"])
    h = jax.nn.relu(h @ p["w2"] + p["b2"])
    h = jax.nn.relu(h @ p["w3"] + p["b3"])
    return h @ p["w4"] + p["b4"]


if __name__ == "__main__":
    key = jax.random.PRNGKey(0)
    kx, kp = jax.random.split(key)

    params = init_params(kp)
    prepared = prepare_params(params)

    # Small-batch (latency) path: TB=8, single grid step.
    B = 2
    x = jax.random.normal(kx, (B, Dimension), jnp.float32)
    out = jax.block_until_ready(fully_connected_net(x, prepared))
    ref = _reference(x, params)
    assert out.shape == (B, NCluster)
    # bf16 operands (f32 accumulation) -> loosened tolerance vs f32 reference.
    assert jnp.allclose(out, ref, atol=3e-2, rtol=3e-2), float(jnp.max(jnp.abs(out - ref)))

    # Ragged medium batch: TB=256, single grid step (no cross-core weight dup).
    B2 = 200
    x2 = jax.random.normal(jax.random.fold_in(kx, 1), (B2, Dimension), jnp.float32)
    out2 = jax.block_until_ready(fully_connected_net(x2, prepared))
    ref2 = _reference(x2, params)
    assert out2.shape == (B2, NCluster)
    assert jnp.allclose(out2, ref2, atol=3e-2, rtol=3e-2), float(jnp.max(jnp.abs(out2 - ref2)))

    # Large batch: TB=512, multi-step grid ("parallel" axis shards across cores).
    B3 = 640
    x3 = jax.random.normal(jax.random.fold_in(kx, 2), (B3, Dimension), jnp.float32)
    out3 = jax.block_until_ready(fully_connected_net(x3, prepared))
    ref3 = _reference(x3, params)
    assert out3.shape == (B3, NCluster)
    assert jnp.allclose(out3, ref3, atol=3e-2, rtol=3e-2), float(jnp.max(jnp.abs(out3 - ref3)))

    print("KERNEL_OK")
</pallas_src>

<mosaic_0001>
module attributes {stable_mosaic.version = 11 : i64} {
  func.func @_mlp_kernel(%arg0: i32, %arg1: memref<8x128xf32, #tpu.memory_space<vmem>>, %arg2: memref<128x1024xbf16, #tpu.memory_space<vmem>>, %arg3: memref<1x1024xf32, #tpu.memory_space<vmem>>, %arg4: memref<1024x512xbf16, #tpu.memory_space<vmem>>, %arg5: memref<1x512xf32, #tpu.memory_space<vmem>>, %arg6: memref<512x256xbf16, #tpu.memory_space<vmem>>, %arg7: memref<1x256xf32, #tpu.memory_space<vmem>>, %arg8: memref<256x128xbf16, #tpu.memory_space<vmem>>, %arg9: memref<1x128xf32, #tpu.memory_space<vmem>>, %arg10: memref<8x128xf32, #tpu.memory_space<vmem>>) attributes {dimension_semantics = [#tpu.dimension_semantics<parallel>], iteration_bounds = array<i64: 1>, scalar_prefetch = 0 : i64, scratch_operands = 0 : i64, tpu.core_type = #tpu.core_type<tc>, window_params = [{transform_indices = @transform_0, window_bounds = array<i64: 8, 128>}, {pipeline_mode = #tpu.pipeline_mode<synchronous>, transform_indices = @transform_1, window_bounds = array<i64: 128, 1024>}, {pipeline_mode = #tpu.pipeline_mode<synchronous>, transform_indices = @transform_2, window_bounds = array<i64: 1, 1024>}, {pipeline_mode = #tpu.pipeline_mode<synchronous>, transform_indices = @transform_3, window_bounds = array<i64: 1024, 512>}, {pipeline_mode = #tpu.pipeline_mode<synchronous>, transform_indices = @transform_4, window_bounds = array<i64: 1, 512>}, {pipeline_mode = #tpu.pipeline_mode<synchronous>, transform_indices = @transform_5, window_bounds = array<i64: 512, 256>}, {pipeline_mode = #tpu.pipeline_mode<synchronous>, transform_indices = @transform_6, window_bounds = array<i64: 1, 256>}, {pipeline_mode = #tpu.pipeline_mode<synchronous>, transform_indices = @transform_7, window_bounds = array<i64: 256, 128>}, {pipeline_mode = #tpu.pipeline_mode<synchronous>, transform_indices = @transform_8, window_bounds = array<i64: 1, 128>}, {transform_indices = @transform_9, window_bounds = array<i64: 8, 128>}]} {
    %c0 = arith.constant 0 : index
    %c0_0 = arith.constant 0 : index
    %0 = vector.load %arg1[%c0, %c0_0] : memref<8x128xf32, #tpu.memory_space<vmem>>, vector<8x128xf32>
    %1 = arith.truncf %0 : vector<8x128xf32> to vector<8x128xbf16>
    %c0_1 = arith.constant 0 : index
    %c0_2 = arith.constant 0 : index
    %2 = vector.load %arg2[%c0_1, %c0_2] : memref<128x1024xbf16, #tpu.memory_space<vmem>>, vector<128x1024xbf16>
    %cst = arith.constant dense<0.000000e+00> : vector<8x1024xf32>
    %3 = tpu.matmul %1, %2, %cst {dimension_numbers = #tpu.dot_dimension_numbers<[1], [0], [0], [1], [0, 0, 1, 1], [], []>} : vector<8x128xbf16>, vector<128x1024xbf16>, vector<8x1024xf32> -> vector<8x1024xf32>
    %c0_3 = arith.constant 0 : index
    %c0_4 = arith.constant 0 : index
    %4 = vector.load %arg3[%c0_3, %c0_4] : memref<1x1024xf32, #tpu.memory_space<vmem>>, vector<1x1024xf32>
    %5 = vector.broadcast %4 : vector<1x1024xf32> to vector<8x1024xf32>
    %6 = arith.addf %3, %5 : vector<8x1024xf32>
    %cst_5 = arith.constant 0.000000e+00 : f32
    %7 = vector.broadcast %cst_5 : f32 to vector<8x1024xf32>
    %8 = arith.maximumf %6, %7 : vector<8x1024xf32>
    %9 = arith.truncf %8 : vector<8x1024xf32> to vector<8x1024xbf16>
    %c0_6 = arith.constant 0 : index
    %c0_7 = arith.constant 0 : index
    %10 = vector.load %arg4[%c0_6, %c0_7] : memref<1024x512xbf16, #tpu.memory_space<vmem>>, vector<1024x512xbf16>
    %cst_8 = arith.constant dense<0.000000e+00> : vector<8x512xf32>
    %11 = tpu.matmul %9, %10, %cst_8 {dimension_numbers = #tpu.dot_dimension_numbers<[1], [0], [0], [1], [0, 0, 1, 1], [], []>} : vector<8x1024xbf16>, vector<1024x512xbf16>, vector<8x512xf32> -> vector<8x512xf32>
    %c0_9 = arith.constant 0 : index
    %c0_10 = arith.constant 0 : index
    %12 = vector.load %arg5[%c0_9, %c0_10] : memref<1x512xf32, #tpu.memory_space<vmem>>, vector<1x512xf32>
    %13 = vector.broadcast %12 : vector<1x512xf32> to vector<8x512xf32>
    %14 = arith.addf %11, %13 : vector<8x512xf32>
    %cst_11 = arith.constant 0.000000e+00 : f32
    %15 = vector.broadcast %cst_11 : f32 to vector<8x512xf32>
    %16 = arith.maximumf %14, %15 : vector<8x512xf32>
    %17 = arith.truncf %16 : vector<8x512xf32> to vector<8x512xbf16>
    %c0_12 = arith.constant 0 : index
    %c0_13 = arith.constant 0 : index
    %18 = vector.load %arg6[%c0_12, %c0_13] : memref<512x256xbf16, #tpu.memory_space<vmem>>, vector<512x256xbf16>
    %cst_14 = arith.constant dense<0.000000e+00> : vector<8x256xf32>
    %19 = tpu.matmul %17, %18, %cst_14 {dimension_numbers = #tpu.dot_dimension_numbers<[1], [0], [0], [1], [0, 0, 1, 1], [], []>} : vector<8x512xbf16>, vector<512x256xbf16>, vector<8x256xf32> -> vector<8x256xf32>
    %c0_15 = arith.constant 0 : index
    %c0_16 = arith.constant 0 : index
    %20 = vector.load %arg7[%c0_15, %c0_16] : memref<1x256xf32, #tpu.memory_space<vmem>>, vector<1x256xf32>
    %21 = vector.broadcast %20 : vector<1x256xf32> to vector<8x256xf32>
    %22 = arith.addf %19, %21 : vector<8x256xf32>
    %cst_17 = arith.constant 0.000000e+00 : f32
    %23 = vector.broadcast %cst_17 : f32 to vector<8x256xf32>
    %24 = arith.maximumf %22, %23 : vector<8x256xf32>
    %25 = arith.truncf %24 : vector<8x256xf32> to vector<8x256xbf16>
    %c0_18 = arith.constant 0 : index
    %c0_19 = arith.constant 0 : index
    %26 = vector.load %arg8[%c0_18, %c0_19] : memref<256x128xbf16, #tpu.memory_space<vmem>>, vector<256x128xbf16>
    %cst_20 = arith.constant dense<0.000000e+00> : vector<8x128xf32>
    %27 = tpu.matmul %25, %26, %cst_20 {dimension_numbers = #tpu.dot_dimension_numbers<[1], [0], [0], [1], [0, 0, 1, 1], [], []>} : vector<8x256xbf16>, vector<256x128xbf16>, vector<8x128xf32> -> vector<8x128xf32>
    %c0_21 = arith.constant 0 : index
    %c0_22 = arith.constant 0 : index
    %28 = vector.load %arg9[%c0_21, %c0_22] : memref<1x128xf32, #tpu.memory_space<vmem>>, vector<1x128xf32>
    %29 = vector.broadcast %28 : vector<1x128xf32> to vector<8x128xf32>
    %30 = arith.addf %27, %29 : vector<8x128xf32>
    %c0_23 = arith.constant 0 : index
    %c0_24 = arith.constant 0 : index
    %31 = vector.load %arg10[%c0_23, %c0_24] : memref<8x128xf32, #tpu.memory_space<vmem>>, vector<8x128xf32>
    tpu.vector_store %arg10[%c0_23, %c0_24], %30 {strides = array<i32>} : memref<8x128xf32, #tpu.memory_space<vmem>>, vector<8x128xf32>,
    return
  }
  func.func @transform_0(%arg0: i32) -> (i32, i32) {
    %c0_i32 = arith.constant 0 : i32
    %c0_i32_0 = arith.constant 0 : i32
    return %arg0, %c0_i32 : i32, i32
  }
  func.func @transform_1(%arg0: i32) -> (i32, i32) {
    %c0_i32 = arith.constant 0 : i32
    %c0_i32_0 = arith.constant 0 : i32
    %c0_i32_1 = arith.constant 0 : i32
    return %c0_i32, %c0_i32_0 : i32, i32
  }
  func.func @transform_2(%arg0: i32) -> (i32, i32) {
    %c0_i32 = arith.constant 0 : i32
    %c0_i32_0 = arith.constant 0 : i32
    %c0_i32_1 = arith.constant 0 : i32
    return %c0_i32, %c0_i32_0 : i32, i32
  }
  func.func @transform_3(%arg0: i32) -> (i32, i32) {
    %c0_i32 = arith.constant 0 : i32
    %c0_i32_0 = arith.constant 0 : i32
    %c0_i32_1 = arith.constant 0 : i32
    return %c0_i32, %c0_i32_0 : i32, i32
  }
  func.func @transform_4(%arg0: i32) -> (i32, i32) {
    %c0_i32 = arith.constant 0 : i32
    %c0_i32_0 = arith.constant 0 : i32
    %c0_i32_1 = arith.constant 0 : i32
    return %c0_i32, %c0_i32_0 : i32, i32
  }
  func.func @transform_5(%arg0: i32) -> (i32, i32) {
    %c0_i32 = arith.constant 0 : i32
    %c0_i32_0 = arith.constant 0 : i32
    %c0_i32_1 = arith.constant 0 : i32
    return %c0_i32, %c0_i32_0 : i32, i32
  }
  func.func @transform_6(%arg0: i32) -> (i32, i32) {
    %c0_i32 = arith.constant 0 : i32
    %c0_i32_0 = arith.constant 0 : i32
    %c0_i32_1 = arith.constant 0 : i32
    return %c0_i32, %c0_i32_0 : i32, i32
  }
  func.func @transform_7(%arg0: i32) -> (i32, i32) {
    %c0_i32 = arith.constant 0 : i32
    %c0_i32_0 = arith.constant 0 : i32
    %c0_i32_1 = arith.constant 0 : i32
    return %c0_i32, %c0_i32_0 : i32, i32
  }
  func.func @transform_8(%arg0: i32) -> (i32, i32) {
    %c0_i32 = arith.constant 0 : i32
    %c0_i32_0 = arith.constant 0 : i32
    %c0_i32_1 = arith.constant 0 : i32
    return %c0_i32, %c0_i32_0 : i32, i32
  }
  func.func @transform_9(%arg0: i32) -> (i32, i32) {
    %c0_i32 = arith.constant 0 : i32
    %c0_i32_0 = arith.constant 0 : i32
    return %arg0, %c0_i32 : i32, i32
  }
}

</mosaic_0001>

<bundles_post_ra>
// kernel: _forward_impl.1
= control target key start
LH: loop header
LB: loop body
LE: loop exit
PB: predicated region body
PF: predicated region fallthrough
CT: control target
= control target key end

     0   :  { %14 = vsyncpa [#allocation3], 0  ;;  %s4516_s0 = inlined_call_operand.vmem [shape: f32[8,128], index: 0, kind: input, shape index: {}]   ;;  %s4517_s1 = inlined_call_operand.hbm [shape: bf16[128,1024], index: 1, kind: input, shape index: {}]   ;;  %s4518_s2 = inlined_call_operand.vmem [shape: f32[1,1024], index: 2, kind: input, shape index: {}]   ;;  %s4519_s3 = inlined_call_operand.hbm [shape: bf16[1024,512], index: 3, kind: input, shape index: {}]   ;;  %s4520_s4 = inlined_call_operand.vmem [shape: f32[1,512], index: 4, kind: input, shape index: {}]   ;;  %s4521_s5 = inlined_call_operand.hbm [shape: bf16[512,256], index: 5, kind: input, shape index: {}]   ;;  %s4522_s6 = inlined_call_operand.vmem [shape: f32[1,256], index: 6, kind: input, shape index: {}]   ;;  %s4523_s7 = inlined_call_operand.hbm [shape: bf16[256,128], index: 7, kind: input, shape index: {}]   ;;  %s4524_s8 = inlined_call_operand.vmem [shape: f32[1,128], index: 8, kind: input, shape index: {}]   ;;  %s4525_s9 = inlined_call_operand.vmem [shape: f32[8,128], index: 9, kind: output, shape index: {}]  }
   0x1   :  { %15 = vsyncpa [#allocation5], 0 }
   0x2   :  { %16 = vsyncpa [#allocation8], 0  ;;  %s4315_s30 = smov [#allocation4]   ;;  %s4221_s13 = scalar_lea.hbm %s4519_s3, 32768 }
   0x3   :  { %s38_s10 = sshll.u32 %s4315_s30, 4  ;;  %p4222_p0 = scmp.ne.s32.totalorder %s4519_s3, %s4221_s13  ;;  %s39_s10 = int_to_ptr.vmem [resolvable:$true] %s38_s10 }
   0x4   :  { %p4225_p1 = scmp.lt.u32.totalorder %s4221_s13, %s4519_s3 }
   0x6   :  { %p4227_p2 = pnand %p4225_p1, %p4222_p0 }
   0x8   :  { %4230 = shalt.err (!%p4227_p2)
}
   0x9   :  { %s4231_s18 = scalar_lea.vmem %s39_s10, 32768  ;;  %p4236_p4 = scmp.lt.s32.totalorder %s39_s10, %s39_s10 }
   0xa   :  { %p4232_p3 = scmp.ne.s32.totalorder %s39_s10, %s4231_s18  ;;  %p4237_p5 = scmp.lt.s32.totalorder %s4231_s18, %s4231_s18 }
   0xc   :  { %p4238_p6 = por %p4237_p5, %p4236_p4 }
   0xe   :  { %p4239_p7 = pnand %p4238_p6, %p4232_p3 }
  0x10   :  { %4242 = shalt.err (!%p4239_p7)
}
  0x11   :  { %s4316_s19 = smov 256   ;;  %s4317_s20 = smov 16  }
  0x12   :  { %44 = dma.hbm_to_vmem [thread:$0]  %s4519_s3, 32768, %s39_s10, [#allocation5], %s4316_s19, %s4316_s19, %s4317_s20  }
  0x13   :  { %s4318_s23 = smov [#allocation2]   ;;  %s4243_s27 = scalar_lea.hbm %s4517_s1, 8192 }
  0x14   :  { %s24_s24 = sshll.u32 %s4318_s23, 4  ;;  %p4244_p8 = scmp.ne.s32.totalorder %s4517_s1, %s4243_s27  ;;  %s25_s24 = int_to_ptr.vmem [resolvable:$true] %s24_s24 }
  0x15   :  { %p4247_p9 = scmp.lt.u32.totalorder %s4243_s27, %s4517_s1 }
  0x17   :  { %p4249_p10 = pnand %p4247_p9, %p4244_p8 }
  0x19   :  { %4252 = shalt.err (!%p4249_p10)
}
  0x1a   :  { %s4253_s12 = scalar_lea.vmem %s25_s24, 8192  ;;  %p4258_p12 = scmp.lt.s32.totalorder %s25_s24, %s25_s24 }
  0x1b   :  { %p4254_p11 = scmp.ne.s32.totalorder %s25_s24, %s4253_s12  ;;  %p4259_p13 = scmp.lt.s32.totalorder %s4253_s12, %s4253_s12 }
  0x1d   :  { %p4260_p0 = por %p4259_p13, %p4258_p12 }
  0x1f   :  { %p4261_p1 = pnand %p4260_p0, %p4254_p11 }
  0x21   :  { %4264 = shalt.err (!%p4261_p1)
}
  0x22   :  { %s4319_s3 = smov 512   ;;  %s4320_s10 = smov 32  }
  0x23   :  { %30 = dma.hbm_to_vmem [thread:$0]  %s4517_s1, 8192, %s25_s24, [#allocation3], %s4319_s3, %s4319_s3, %s4320_s10  }
  0x24   :  { %s4321_s15 = smov [#allocation6]   ;;  %s4265_s19 = scalar_lea.hbm %s4521_s5, 8192 }
  0x25   :  { %s52_s16 = sshll.u32 %s4321_s15, 4  ;;  %p4266_p2 = scmp.ne.s32.totalorder %s4521_s5, %s4265_s19  ;;  %s53_s16 = int_to_ptr.vmem [resolvable:$true] %s52_s16 }
  0x26   :  { %p4269_p3 = scmp.lt.u32.totalorder %s4265_s19, %s4521_s5 }
  0x28   :  { %p4271_p4 = pnand %p4269_p3, %p4266_p2 }
  0x2a   :  { %4274 = shalt.err (!%p4271_p4)
}
  0x2b   :  { %s4275_s25 = scalar_lea.vmem %s53_s16, 8192  ;;  %p4280_p6 = scmp.lt.s32.totalorder %s53_s16, %s53_s16 }
  0x2c   :  { %p4276_p5 = scmp.ne.s32.totalorder %s53_s16, %s4275_s25  ;;  %p4281_p7 = scmp.lt.s32.totalorder %s4275_s25, %s4275_s25 }
  0x2e   :  { %p4282_p8 = por %p4281_p7, %p4280_p6 }
  0x30   :  { %p4283_p9 = pnand %p4282_p8, %p4276_p5 }
  0x32   :  { %4286 = shalt.err (!%p4283_p9)
}
  0x33   :  { %s4322_s1 = smov 128   ;;  %s4323_s24 = smov 8  }
  0x34   :  { %58 = dma.hbm_to_vmem [thread:$0]  %s4521_s5, 8192, %s53_s16, [#allocation5], %s4322_s1, %s4322_s1, %s4323_s24  }
  0x35   :  { %s4324_s28 = smov [#allocation7]   ;;  %s4287_s12 = scalar_lea.hbm %s4523_s7, 2048 }
  0x36   :  { %s66_s29 = sshll.u32 %s4324_s28, 4  ;;  %p4288_p10 = scmp.ne.s32.totalorder %s4523_s7, %s4287_s12  ;;  %s67_s29 = int_to_ptr.vmem [resolvable:$true] %s66_s29 }
  0x37   :  { %p4291_p11 = scmp.lt.u32.totalorder %s4287_s12, %s4523_s7 }
  0x39   :  { %p4293_p12 = pnand %p4291_p11, %p4288_p10 }
  0x3b   :  { %4296 = shalt.err (!%p4293_p12)
}
  0x3c   :  { %s4297_s15 = scalar_lea.vmem %s67_s29, 2048  ;;  %p4302_p0 = scmp.lt.s32.totalorder %s67_s29, %s67_s29 }
  0x3d   :  { %p4298_p13 = scmp.ne.s32.totalorder %s67_s29, %s4297_s15  ;;  %p4303_p1 = scmp.lt.s32.totalorder %s4297_s15, %s4297_s15 }
  0x3f   :  { %p4304_p2 = por %p4303_p1, %p4302_p0 }
  0x41   :  { %p4305_p3 = pnand %p4304_p2, %p4298_p13 }
  0x43   :  { %4308 = shalt.err (!%p4305_p3)
}
  0x44   :  { %s4325_s5 = smov 64   ;;  %s4326_s16 = smov 4  }
  0x45   :  { %72 = dma.hbm_to_vmem [thread:$0]  %s4523_s7, 2048, %s67_s29, [#allocation8], %s4325_s5, %s4325_s5, %s4326_s16  }
  0x46   :  { %4309 = dma.done.wait [#allocation3], 8192  }
  0x47   :  { %4310 = vsyncadd [#allocation3], 4294959104 }
  0x48   :  { %4311 = dma.done.wait [#allocation5], 40960  }
  0x49   :  { %4312 = vsyncadd [#allocation5], 4294926336 }
  0x4a   :  { %4313 = dma.done.wait [#allocation8], 2048  }
  0x4b   :  { %4314 = vsyncadd [#allocation8], 4294965248  ;;  %v4327_v0 = vmov 0   ;;  %v90_v1 = vld [vmem:[#allocation2] sm:$0xff]  ;;  %v92_v18 = vld [vmem:[#allocation2 + $0x10] sm:$0xff] }
  0x4c   :  { %548 = vmatprep.mubr.bf16.mxu1 %v4327_v0  ;;  %630 = vmatprep.mubr.bf16.mxu0 %v4327_v0  ;;  %v94_v2 = vld [vmem:[#allocation2 + $0x20] sm:$0xff]  ;;  %v96_v19 = vld [vmem:[#allocation2 + $0x30] sm:$0xff]  ;;  %v91_v53 = vld [vmem:[#allocation2 + $0x8] sm:$0xff] }
  0x4d   :  { %v98_v3 = vld [vmem:[#allocation2 + $0x40] sm:$0xff]  ;;  %v3256_v4 = vcombine.high %v90_v1, %v94_v2  ;;  %v3255_v5 = vcombine.low %v90_v1, %v94_v2  ;;  %v100_v20 = vld [vmem:[#allocation2 + $0x50] sm:$0xff]  ;;  %v3260_v22 = vcombine.high %v92_v18, %v96_v19  ;;  %v3259_v23 = vcombine.low %v92_v18, %v96_v19  ;;  %v95_v54 = vld [vmem:[#allocation2 + $0x28] sm:$0xff] }
  0x4e   :  { %v102_v6 = vld [vmem:[#allocation2 + $0x60] sm:$0xff]  ;;  %v104_v24 = vld [vmem:[#allocation2 + $0x70] sm:$0xff]  ;;  %v3258_v59 = vcombine.high %v91_v53, %v95_v54  ;;  %v99_v60 = vld [vmem:[#allocation2 + $0x48] sm:$0xff] }
  0x4f   :  { %v3264_v7 = vcombine.high %v98_v3, %v102_v6  ;;  %v106_v8 = vld [vmem:[#allocation2 + $0x80] sm:$0xff]  ;;  %516 = vmatprep.subr.bf16.mxu1 %v3256_v4  ;;  %v3263_v10 = vcombine.low %v98_v3, %v102_v6  ;;  %v3268_v26 = vcombine.high %v100_v20, %v104_v24  ;;  %v108_v27 = vld [vmem:[#allocation2 + $0x90] sm:$0xff]  ;;  %598 = vmatprep.subr.bf16.mxu0 %v3260_v22  ;;  %v103_v61 = vld [vmem:[#allocation2 + $0x68] sm:$0xff] }
  0x50   :  { %v110_v9 = vld [vmem:[#allocation2 + $0xa0] sm:$0xff]  ;;  %517 = vmatpush1.bf16.msra.mxu1 %v3255_v5  ;;  %v112_v28 = vld [vmem:[#allocation2 + $0xb0] sm:$0xff]  ;;  %599 = vmatpush1.bf16.msra.mxu0 %v3259_v23  ;;  %v3267_v31 = vcombine.low %v100_v20, %v104_v24  ;;  %v3257_v3 = vcombine.low %v91_v53, %v95_v54  ;;  %v3266_v4 = vcombine.high %v99_v60, %v103_v61  ;;  %v123_v20 = vld [vmem:[#allocation2 + $0x108] sm:$0xff] }
  0x51   :  { %518 = vmatprep.subr.bf16.mxu1 %v3264_v7  ;;  %v3272_v11 = vcombine.high %v106_v8, %v110_v9  ;;  %v114_v12 = vld [vmem:[#allocation2 + $0xc0] sm:$0xff]  ;;  %v3271_v14 = vcombine.low %v106_v8, %v110_v9  ;;  %600 = vmatprep.subr.bf16.mxu0 %v3268_v26  ;;  %v3276_v33 = vcombine.high %v108_v27, %v112_v28  ;;  %v116_v35 = vld [vmem:[#allocation2 + $0xd0] sm:$0xff]  ;;  %v107_v8 = vld [vmem:[#allocation2 + $0x88] sm:$0xff] }
  0x52   :  { %v118_v13 = vld [vmem:[#allocation2 + $0xe0] sm:$0xff]  ;;  %v120_v36 = vld [vmem:[#allocation2 + $0xf0] sm:$0xff]  ;;  %v3275_v39 = vcombine.low %v108_v27, %v112_v28  ;;  %v111_v9 = vld [vmem:[#allocation2 + $0xa8] sm:$0xff] }
  0x53   :  { %v3280_v15 = vcombine.high %v114_v12, %v118_v13  ;;  %v122_v16 = vld [vmem:[#allocation2 + $0x100] sm:$0xff]  ;;  %v3279_v21 = vcombine.low %v114_v12, %v118_v13  ;;  %v3284_v41 = vcombine.high %v116_v35, %v120_v36  ;;  %v124_v43 = vld [vmem:[#allocation2 + $0x110] sm:$0xff]  ;;  %v3283_v47 = vcombine.low %v116_v35, %v120_v36  ;;  %v131_v26 = vld [vmem:[#allocation2 + $0x148] sm:$0xff] }
  0x54   :  { %519 = vmatpush1.bf16.msra.mxu1 %v3263_v10  ;;  %v126_v17 = vld [vmem:[#allocation2 + $0x120] sm:$0xff]  ;;  %601 = vmatpush1.bf16.msra.mxu0 %v3267_v31  ;;  %v128_v44 = vld [vmem:[#allocation2 + $0x130] sm:$0xff]  ;;  %v3274_v13 = vcombine.high %v107_v8, %v111_v9  ;;  %v135_v27 = vld [vmem:[#allocation2 + $0x168] sm:$0xff] }
  0x55   :  { %520 = vmatprep.subr.bf16.mxu1 %v3272_v11  ;;  %v3288_v25 = vcombine.high %v122_v16, %v126_v17  ;;  %v130_v29 = vld [vmem:[#allocation2 + $0x140] sm:$0xff]  ;;  %v3287_v32 = vcombine.low %v122_v16, %v126_v17  ;;  %602 = vmatprep.subr.bf16.mxu0 %v3276_v33  ;;  %v3292_v49 = vcombine.high %v124_v43, %v128_v44  ;;  %v132_v51 = vld [vmem:[#allocation2 + $0x150] sm:$0xff]  ;;  %v143_v33 = vld [vmem:[#allocation2 + $0x1a8] sm:$0xff] }
  0x56   :  { %v134_v30 = vld [vmem:[#allocation2 + $0x160] sm:$0xff]  ;;  %v136_v52 = vld [vmem:[#allocation2 + $0x170] sm:$0xff]  ;;  %v3291_v55 = vcombine.low %v124_v43, %v128_v44  ;;  %v3265_v11 = vcombine.low %v99_v60, %v103_v61  ;;  %v3273_v17 = vcombine.low %v107_v8, %v111_v9  ;;  %v3298_v31 = vcombine.high %v131_v26, %v135_v27  ;;  %v93_v44 = vld [vmem:[#allocation2 + $0x18] sm:$0xff] }
  0x57   :  { %v3296_v34 = vcombine.high %v130_v29, %v134_v30  ;;  %v138_v37 = vld [vmem:[#allocation2 + $0x180] sm:$0xff]  ;;  %v3295_v40 = vcombine.low %v130_v29, %v134_v30  ;;  %v3300_v58 = vcombine.high %v132_v51, %v136_v52  ;;  %v140_v62 = vld [vmem:[#allocation2 + $0x190] sm:$0xff]  ;;  %v3299_v2 = vcombine.low %v132_v51, %v136_v52  ;;  %v117_v61 = vld [vmem:[#allocation2 + $0xd8] sm:$0xff] }
  0x58   :  { %521 = vmatpush1.bf16.msra.mxu1 %v3271_v14  ;;  %v142_v38 = vld [vmem:[#allocation2 + $0x1a0] sm:$0xff]  ;;  %603 = vmatpush1.bf16.msra.mxu0 %v3275_v39  ;;  %v144_v63 = vld [vmem:[#allocation2 + $0x1b0] sm:$0xff]  ;;  %v115_v14 = vld [vmem:[#allocation2 + $0xc8] sm:$0xff]  ;;  %v3297_v35 = vcombine.low %v131_v26, %v135_v27 }
  0x59   :  { %522 = vmatprep.subr.bf16.mxu1 %v3280_v15  ;;  %v3304_v42 = vcombine.high %v138_v37, %v142_v38  ;;  %v146_v45 = vld [vmem:[#allocation2 + $0x1c0] sm:$0xff]  ;;  %v3303_v48 = vcombine.low %v138_v37, %v142_v38  ;;  %604 = vmatprep.subr.bf16.mxu0 %v3284_v41  ;;  %v3308_v5 = vcombine.high %v140_v62, %v144_v63  ;;  %v148_v6 = vld [vmem:[#allocation2 + $0x1d0] sm:$0xff]  ;;  %v119_v15 = vld [vmem:[#allocation2 + $0xe8] sm:$0xff] }
  0x5a   :  { %v150_v46 = vld [vmem:[#allocation2 + $0x1e0] sm:$0xff]  ;;  %v152_v7 = vld [vmem:[#allocation2 + $0x1f0] sm:$0xff]  ;;  %v3307_v10 = vcombine.low %v140_v62, %v144_v63  ;;  %v3282_v19 = vcombine.high %v115_v14, %v119_v15  ;;  %v3281_v23 = vcombine.low %v115_v14, %v119_v15  ;;  %v147_v38 = vld [vmem:[#allocation2 + $0x1c8] sm:$0xff] }
  0x5b   :  { %v3312_v50 = vcombine.high %v146_v45, %v150_v46  ;;  %v3311_v56 = vcombine.low %v146_v45, %v150_v46  ;;  %v88_v57 = vld [vmem:[%s4516_s0] sm:$0xff]  ;;  %v3316_v12 = vcombine.high %v148_v6, %v152_v7  ;;  %v3315_v16 = vcombine.low %v148_v6, %v152_v7  ;;  %v151_v39 = vld [vmem:[#allocation2 + $0x1e8] sm:$0xff]  ;;  %v97_v45 = vld [vmem:[#allocation2 + $0x38] sm:$0xff] }
  0x5c   :  { %523 = vmatpush1.bf16.msra.mxu1 %v3279_v21  ;;  %605 = vmatpush1.bf16.msra.mxu0 %v3283_v47  ;;  %v4431_v1 = vpack.c.bf16 %v88_v57, %v88_v57  ;;  %v3727_v18 = vld [vmem:[#allocation4 + $0x4] ss:$16 sps:$4 sm:$0xff]   ;;  %v127_v21 = vld [vmem:[#allocation2 + $0x128] sm:$0xff]  ;;  %v3725_v22 = vld [vmem:[#allocation4] ss:$16 sps:$4 sm:$0xff]   ;;  %v3314_v43 = vcombine.high %v147_v38, %v151_v39  ;;  %v3262_v51 = vcombine.high %v93_v44, %v97_v45 }
  0x5d   :  { %524 = vmatprep.subr.bf16.mxu1 %v3288_v25  ;;  %606 = vmatprep.subr.bf16.mxu0 %v3292_v49  ;;  %v3733_v24 = vld [vmem:[#allocation4 + $0x24] ss:$16 sps:$4 sm:$0xff]   ;;  %v3290_v25 = vcombine.high %v123_v20, %v127_v21  ;;  %v3731_v28 = vld [vmem:[#allocation4 + $0x20] ss:$16 sps:$4 sm:$0xff]   ;;  %v3289_v29 = vcombine.low %v123_v20, %v127_v21  ;;  %v101_v49 = vld [vmem:[#allocation2 + $0x58] sm:$0xff]  ;;  %v3261_v54 = vcombine.low %v93_v44, %v97_v45 }
  0x5e   :  { %v3739_v30 = vld [vmem:[#allocation4 + $0x44] ss:$16 sps:$4 sm:$0xff]   ;;  %v3749_v46 = vld [vmem:[#allocation4 + $0x80] ss:$16 sps:$4 sm:$0xff]   ;;  %v121_v62 = vld [vmem:[#allocation2 + $0xf8] sm:$0xff] }
  0x5f   :  { %v3745_v36 = vld [vmem:[#allocation4 + $0x64] ss:$16 sps:$4 sm:$0xff]   ;;  %v3755_v52 = vld [vmem:[#allocation4 + $0xa0] ss:$16 sps:$4 sm:$0xff]   ;;  %v129_v6 = vld [vmem:[#allocation2 + $0x138] sm:$0xff]  ;;  %v3286_v7 = vcombine.high %v117_v61, %v121_v62 }
  0x60   :  { %525 = vmatpush1.bf16.msra.mxu1 %v3287_v32  ;;  %607 = vmatpush1.bf16.msra.mxu0 %v3291_v55  ;;  %v139_v32 = vld [vmem:[#allocation2 + $0x188] sm:$0xff]  ;;  %v3757_v47 = vld [vmem:[#allocation4 + $0xa4] ss:$16 sps:$4 sm:$0xff]   ;;  %v109_v55 = vld [vmem:[#allocation2 + $0x98] sm:$0xff] }
  0x61   :  { %526 = vmatprep.subr.bf16.mxu1 %v3296_v34  ;;  %608 = vmatprep.subr.bf16.mxu0 %v3300_v58  ;;  %v3737_v34 = vld [vmem:[#allocation4 + $0x40] ss:$16 sps:$4 sm:$0xff]   ;;  %v3306_v37 = vcombine.high %v139_v32, %v143_v33  ;;  %v3305_v41 = vcombine.low %v139_v32, %v143_v33  ;;  %v3763_v53 = vld [vmem:[#allocation4 + $0xc4] ss:$16 sps:$4 sm:$0xff]   ;;  %v3758_v44 = vld [vmem:[#allocation4 + $0xa8] ss:$16 sps:$4 sm:$0xff]  }
  0x62   :  { %v3761_v58 = vld [vmem:[#allocation4 + $0xc0] ss:$16 sps:$4 sm:$0xff]   ;;  %v3781_v9 = vld [vmem:[#allocation4 + $0x124] ss:$16 sps:$4 sm:$0xff]  }
  0x63   :  { %v3773_v8 = vld [vmem:[#allocation4 + $0x100] ss:$16 sps:$4 sm:$0xff]   ;;  %v3787_v14 = vld [vmem:[#allocation4 + $0x144] ss:$16 sps:$4 sm:$0xff]  }
  0x64   :  { %527 = vmatpush1.bf16.msra.mxu1 %v3295_v40  ;;  %609 = vmatpush1.bf16.msra.mxu0 %v3299_v2  ;;  %v3743_v40 = vld [vmem:[#allocation4 + $0x60] ss:$16 sps:$4 sm:$0xff]   ;;  %v3793_v20 = vld [vmem:[#allocation4 + $0x164] ss:$16 sps:$4 sm:$0xff]  }
  0x65   :  { %528 = vmatprep.subr.bf16.mxu1 %v3304_v42  ;;  %610 = vmatprep.subr.bf16.mxu0 %v3308_v5  ;;  %v3751_v42 = vld [vmem:[#allocation4 + $0x84] ss:$16 sps:$4 sm:$0xff]   ;;  %v3767_v2 = vld [vmem:[#allocation4 + $0xe0] ss:$16 sps:$4 sm:$0xff]   ;;  %v125_v5 = vld [vmem:[#allocation2 + $0x118] sm:$0xff] }
  0x66   :  { %v3293_v15 = vcombine.low %v125_v5, %v129_v6  ;;  %v3799_v26 = vld [vmem:[#allocation4 + $0x184] ss:$16 sps:$4 sm:$0xff]   ;;  %v3803_v33 = vld [vmem:[#allocation4 + $0x1a0] ss:$16 sps:$4 sm:$0xff]  }
  0x67   :  { %v3811_v45 = vld [vmem:[#allocation4 + $0x1c4] ss:$16 sps:$4 sm:$0xff]  }
  0x68   :  { %529 = vmatpush1.bf16.msra.mxu1 %v3303_v48  ;;  %611 = vmatpush1.bf16.msra.mxu0 %v3307_v10  ;;  %v3313_v48 = vcombine.low %v147_v38, %v151_v39  ;;  %v3285_v10 = vcombine.low %v117_v61, %v121_v62  ;;  %v3740_v38 = vld [vmem:[#allocation4 + $0x48] ss:$16 sps:$4 sm:$0xff]   ;;  %v3748_v39 = vld [vmem:[#allocation4 + $0x6c] ss:$16 sps:$4 sm:$0xff]  }
  0x69   :  { %530 = vmatprep.subr.bf16.mxu1 %v3312_v50  ;;  %612 = vmatprep.subr.bf16.mxu0 %v3316_v12  ;;  %v105_v50 = vld [vmem:[#allocation2 + $0x78] sm:$0xff]  ;;  %v3294_v12 = vcombine.high %v125_v5, %v129_v6 }
  0x6a   :  { %v3270_v57 = vcombine.high %v101_v49, %v105_v50  ;;  %v3269_v60 = vcombine.low %v101_v49, %v105_v50  ;;  %v3772_v49 = vld [vmem:[#allocation4 + $0xec] ss:$16 sps:$4 sm:$0xff]   ;;  %v3815_v50 = vld [vmem:[#allocation4 + $0x1e0] ss:$16 sps:$4 sm:$0xff]   ;;  %v3800_v62 = vld [vmem:[#allocation4 + $0x188] ss:$16 sps:$4 sm:$0xff]  }
  0x6b   :  { %v3802_v61 = vld [vmem:[#allocation4 + $0x18c] ss:$16 sps:$4 sm:$0xff]   ;;  %v3818_v6 = vld [vmem:[#allocation4 + $0x1e8] ss:$16 sps:$4 sm:$0xff]  }
  0x6c   :  { %531 = vmatpush1.bf16.msra.mxu1 %v3311_v56  ;;  %613 = vmatpush1.bf16.msra.mxu0 %v3315_v16  ;;  %v113_v56 = vld [vmem:[#allocation2 + $0xb8] sm:$0xff] }
  0x6d   :  { %557 = vmatprep.subr.bf16.mxu1 %v3258_v59  ;;  %2254 = vmatprep.subr.bf16.mxu0 %v3727_v18  ;;  %v3769_v59 = vld [vmem:[#allocation4 + $0xe4] ss:$16 sps:$4 sm:$0xff]   ;;  %v3278_v63 = vcombine.high %v109_v55, %v113_v56  ;;  %v141_v16 = vld [vmem:[#allocation2 + $0x198] sm:$0xff] }
  0x6e   :  { %v3820_v5 = vld [vmem:[#allocation4 + $0x1ec] ss:$16 sps:$4 sm:$0xff]  }
  0x6f   :  { %549 = vmatmul.mubr.bf16.vlgmr.msra.gmra.mrb[0].mxu1 %v4431_v1  ;;  %631 = vmatmul.mubr.bf16.vlgmr.msra.gmra.mrb[0].mxu0 %v4431_v1 }
  0x70   :  { %558 = vmatpush1.bf16.msra.mxu1 %v3257_v3  ;;  %589 = vmatprep.mubr.bf16.mxu1 %v4327_v0  ;;  %v3775_v3 = vld [vmem:[#allocation4 + $0x104] ss:$16 sps:$4 sm:$0xff]  }
  0x71   :  { %559 = vmatprep.subr.bf16.mxu1 %v3266_v4  ;;  %2255 = vmatpush1.bf16.msra.mxu0 %v3725_v22  ;;  %v3277_v4 = vcombine.low %v109_v55, %v113_v56  ;;  %v149_v22 = vld [vmem:[#allocation2 + $0x1d8] sm:$0xff] }
  0x72   :  { %2256 = vmatprep.subr.bf16.mxu0 %v3733_v24  ;;  %v3784_v55 = vld [vmem:[#allocation4 + $0x12c] ss:$16 sps:$4 sm:$0xff]   ;;  %v3782_v56 = vld [vmem:[#allocation4 + $0x128] ss:$16 sps:$4 sm:$0xff]  }
  0x74   :  { %560 = vmatpush1.bf16.msra.mxu1 %v3265_v11  ;;  %v133_v11 = vld [vmem:[#allocation2 + $0x158] sm:$0xff] }
  0x75   :  { %561 = vmatprep.subr.bf16.mxu1 %v3274_v13  ;;  %2257 = vmatpush1.bf16.msra.mxu0 %v3731_v28  ;;  %v3779_v13 = vld [vmem:[#allocation4 + $0x120] ss:$16 sps:$4 sm:$0xff]  }
  0x76   :  { %2258 = vmatprep.subr.bf16.mxu0 %v3739_v30  ;;  %v3805_v30 = vld [vmem:[#allocation4 + $0x1a4] ss:$16 sps:$4 sm:$0xff]  }
  0x78   :  { %562 = vmatpush1.bf16.msra.mxu1 %v3273_v17  ;;  %v145_v17 = vld [vmem:[#allocation2 + $0x1b8] sm:$0xff] }
  0x79   :  { %563 = vmatprep.subr.bf16.mxu1 %v3282_v19  ;;  %2259 = vmatpush1.bf16.msra.mxu0 %v3737_v34  ;;  %v3785_v19 = vld [vmem:[#allocation4 + $0x140] ss:$16 sps:$4 sm:$0xff]   ;;  %v3310_v24 = vcombine.high %v141_v16, %v145_v17  ;;  %v3309_v27 = vcombine.low %v141_v16, %v145_v17  ;;  %v3728_v34 = vld [vmem:[#allocation4 + $0x8] ss:$16 sps:$4 sm:$0xff]  }
  0x7a   :  { %2260 = vmatprep.subr.bf16.mxu0 %v3745_v36  ;;  %v3734_v36 = vld [vmem:[#allocation4 + $0x28] ss:$16 sps:$4 sm:$0xff]  }
  0x7c   :  { %564 = vmatpush1.bf16.msra.mxu1 %v3281_v23  ;;  %v153_v23 = vld [vmem:[#allocation2 + $0x1f8] sm:$0xff] }
  0x7d   :  { %565 = vmatprep.subr.bf16.mxu1 %v3290_v25  ;;  %2261 = vmatpush1.bf16.msra.mxu0 %v3743_v40  ;;  %v3791_v25 = vld [vmem:[#allocation4 + $0x160] ss:$16 sps:$4 sm:$0xff]   ;;  %v3318_v28 = vcombine.high %v149_v22, %v153_v23  ;;  %v3317_v32 = vcombine.low %v149_v22, %v153_v23  ;;  %v3746_v40 = vld [vmem:[#allocation4 + $0x68] ss:$16 sps:$4 sm:$0xff]  }
  0x7e   :  { %2262 = vmatprep.subr.bf16.mxu0 %v3751_v42  ;;  %v3752_v42 = vld [vmem:[#allocation4 + $0x88] ss:$16 sps:$4 sm:$0xff]   ;;  %v3821_v23 = vld [vmem:[#allocation4 + $0x200] ss:$16 sps:$4 sm:$0xff]  }
  0x80   :  { %566 = vmatpush1.bf16.msra.mxu1 %v3289_v29  ;;  %v3797_v29 = vld [vmem:[#allocation4 + $0x180] ss:$16 sps:$4 sm:$0xff]  }
  0x81   :  { %567 = vmatprep.subr.bf16.mxu1 %v3298_v31  ;;  %2263 = vmatpush1.bf16.msra.mxu0 %v3749_v46  ;;  %v3730_v31 = vld [vmem:[#allocation4 + $0xc] ss:$16 sps:$4 sm:$0xff]   ;;  %v3809_v46 = vld [vmem:[#allocation4 + $0x1c0] ss:$16 sps:$4 sm:$0xff]  }
  0x82   :  { %2264 = vmatprep.subr.bf16.mxu0 %v3757_v47  ;;  %v3764_v47 = vld [vmem:[#allocation4 + $0xc8] ss:$16 sps:$4 sm:$0xff]  }
  0x84   :  { %568 = vmatpush1.bf16.msra.mxu1 %v3297_v35  ;;  %v3736_v35 = vld [vmem:[#allocation4 + $0x2c] ss:$16 sps:$4 sm:$0xff]  }
  0x85   :  { %569 = vmatprep.subr.bf16.mxu1 %v3306_v37  ;;  %2265 = vmatpush1.bf16.msra.mxu0 %v3755_v52  ;;  %v3742_v37 = vld [vmem:[#allocation4 + $0x4c] ss:$16 sps:$4 sm:$0xff]   ;;  %v3823_v52 = vld [vmem:[#allocation4 + $0x204] ss:$16 sps:$4 sm:$0xff]  }
  0x86   :  { %2266 = vmatprep.subr.bf16.mxu0 %v3763_v53  ;;  %v3778_v53 = vld [vmem:[#allocation4 + $0x10c] ss:$16 sps:$4 sm:$0xff]  }
  0x88   :  { %570 = vmatpush1.bf16.msra.mxu1 %v3305_v41  ;;  %v3754_v41 = vld [vmem:[#allocation4 + $0x8c] ss:$16 sps:$4 sm:$0xff]  }
  0x89   :  { %571 = vmatprep.subr.bf16.mxu1 %v3314_v43  ;;  %2267 = vmatpush1.bf16.msra.mxu0 %v3761_v58  ;;  %v3760_v43 = vld [vmem:[#allocation4 + $0xac] ss:$16 sps:$4 sm:$0xff]   ;;  %v3788_v58 = vld [vmem:[#allocation4 + $0x148] ss:$16 sps:$4 sm:$0xff]  }
  0x8a   :  { %2268 = vmatprep.subr.bf16.mxu0 %v3769_v59  ;;  %v3796_v59 = vld [vmem:[#allocation4 + $0x16c] ss:$16 sps:$4 sm:$0xff]  }
  0x8c   :  { %572 = vmatpush1.bf16.msra.mxu1 %v3313_v48  ;;  %v3817_v48 = vld [vmem:[#allocation4 + $0x1e4] ss:$16 sps:$4 sm:$0xff]  }
  0x8d   :  { %639 = vmatprep.subr.bf16.mxu1 %v3262_v51  ;;  %2269 = vmatpush1.bf16.msra.mxu0 %v3767_v2  ;;  %v3770_v51 = vld [vmem:[#allocation4 + $0xe8] ss:$16 sps:$4 sm:$0xff]  }
  0x8e   :  { %2270 = vmatprep.subr.bf16.mxu0 %v3775_v3  ;;  %v3806_v2 = vld [vmem:[#allocation4 + $0x1a8] ss:$16 sps:$4 sm:$0xff]   ;;  %v3814_v3 = vld [vmem:[#allocation4 + $0x1cc] ss:$16 sps:$4 sm:$0xff]  }
  0x8f   :  { %590 = vmatmul.mubr.bf16.vlgmr.msra.gmra.mrb[4].mxu1 %v4431_v1 }
  0x90   :  { %640 = vmatpush1.bf16.msra.mxu1 %v3261_v54  ;;  %671 = vmatprep.mubr.bf16.mxu1 %v4327_v0  ;;  %v137_v0 = vld [vmem:[#allocation2 + $0x178] sm:$0xff] }
  0x91   :  { %641 = vmatprep.subr.bf16.mxu1 %v3270_v57  ;;  %2271 = vmatpush1.bf16.msra.mxu0 %v3773_v8  ;;  %v3302_v18 = vcombine.high %v133_v11, %v137_v0  ;;  %v3301_v21 = vcombine.low %v133_v11, %v137_v0  ;;  %v3776_v54 = vld [vmem:[#allocation4 + $0x108] ss:$16 sps:$4 sm:$0xff]   ;;  %v3790_v57 = vld [vmem:[#allocation4 + $0x14c] ss:$16 sps:$4 sm:$0xff]   ;;  %v156_v8 = vlaneseq  ;;  %v4447_v11 = vld [vmem:[%s4518_s2] sm:$0xff] }
  0x92   :  { %2272 = vmatprep.subr.bf16.mxu0 %v3781_v9 }
  0x93   :  { %v4439_v9 = vshrl.u32 %v156_v8, 7  ;;  %v3877_v8 = vld [vmem:[#allocation4 + $0x324] ss:$16 sps:$4 sm:$0xff]  }
  0x94   :  { %642 = vmatpush1.bf16.msra.mxu1 %v3269_v60  ;;  %v3794_v60 = vld [vmem:[#allocation4 + $0x168] ss:$16 sps:$4 sm:$0xff]  }
  0x95   :  { %643 = vmatprep.subr.bf16.mxu1 %v3278_v63  ;;  %2273 = vmatpush1.bf16.msra.mxu0 %v3779_v13  ;;  %v3808_v63 = vld [vmem:[#allocation4 + $0x1ac] ss:$16 sps:$4 sm:$0xff]   ;;  %v4450_v0 = vsub.s32 1, %v4439_v9 }
  0x96   :  { %2274 = vmatprep.subr.bf16.mxu0 %v3787_v14 }
  0x97   :  { %v163_v13 = vrot.slane %v4447_v11, %v4450_v0 }
  0x98   :  { %644 = vmatpush1.bf16.msra.mxu1 %v3277_v4  ;;  %v3812_v4 = vld [vmem:[#allocation4 + $0x1c8] ss:$16 sps:$4 sm:$0xff]  }
  0x99   :  { %645 = vmatprep.subr.bf16.mxu1 %v3286_v7  ;;  %2275 = vmatpush1.bf16.msra.mxu0 %v3785_v19  ;;  %v3826_v7 = vld [vmem:[#allocation4 + $0x20c] ss:$16 sps:$4 sm:$0xff]  }
  0x9a   :  { %2276 = vmatprep.subr.bf16.mxu0 %v3793_v20 }
  0x9c   :  { %646 = vmatpush1.bf16.msra.mxu1 %v3285_v10  ;;  %v4442_v10 = vsub.s32 0, %v4439_v9 }
  0x9d   :  { %647 = vmatprep.subr.bf16.mxu1 %v3294_v12  ;;  %2277 = vmatpush1.bf16.msra.mxu0 %v3791_v25 }
  0x9e   :  { %2278 = vmatprep.subr.bf16.mxu0 %v3799_v26  ;;  %v159_v12 = vrot.slane %v4447_v11, %v4442_v10  ;;  %v3829_v26 = vld [vmem:[#allocation4 + $0x224] ss:$16 sps:$4 sm:$0xff]  }
  0xa0   :  { %648 = vmatpush1.bf16.msra.mxu1 %v3293_v15 }
  0xa1   :  { %649 = vmatprep.subr.bf16.mxu1 %v3302_v18  ;;  %2279 = vmatpush1.bf16.msra.mxu0 %v3797_v29  ;;  %v3830_v29 = vld [vmem:[#allocation4 + $0x228] ss:$16 sps:$4 sm:$0xff]  }
  0xa2   :  { %2280 = vmatprep.subr.bf16.mxu0 %v3805_v30  ;;  %v3835_v30 = vld [vmem:[#allocation4 + $0x244] ss:$16 sps:$4 sm:$0xff]  }
  0xa4   :  { %650 = vmatpush1.bf16.msra.mxu1 %v3301_v21 }
  0xa5   :  { %651 = vmatprep.subr.bf16.mxu1 %v3310_v24  ;;  %2281 = vmatpush1.bf16.msra.mxu0 %v3803_v33  ;;  %v3824_v24 = vld [vmem:[#allocation4 + $0x208] ss:$16 sps:$4 sm:$0xff]  }
  0xa6   :  { %2282 = vmatprep.subr.bf16.mxu0 %v3811_v45  ;;  %v3848_v45 = vld [vmem:[#allocation4 + $0x288] ss:$16 sps:$4 sm:$0xff]  }
  0xa8   :  { %652 = vmatpush1.bf16.msra.mxu1 %v3309_v27  ;;  %v3832_v27 = vld [vmem:[#allocation4 + $0x22c] ss:$16 sps:$4 sm:$0xff]  }
  0xa9   :  { %653 = vmatprep.subr.bf16.mxu1 %v3318_v28  ;;  %2283 = vmatpush1.bf16.msra.mxu0 %v3809_v46  ;;  %v3827_v28 = vld [vmem:[#allocation4 + $0x220] ss:$16 sps:$4 sm:$0xff]   ;;  %v3856_v46 = vld [vmem:[#allocation4 + $0x2ac] ss:$16 sps:$4 sm:$0xff]  }
  0xaa   :  { %2284 = vmatprep.subr.bf16.mxu0 %v3817_v48  ;;  %v3854_v48 = vld [vmem:[#allocation4 + $0x2a8] ss:$16 sps:$4 sm:$0xff]  }
  0xac   :  { %654 = vmatpush1.bf16.msra.mxu1 %v3317_v32 }
  0xad   :  { %2418 = vmatprep.subr.bf16.mxu1 %v3730_v31  ;;  %2285 = vmatpush1.bf16.msra.mxu0 %v3815_v50  ;;  %v3838_v31 = vld [vmem:[#allocation4 + $0x24c] ss:$16 sps:$4 sm:$0xff]   ;;  %v3859_v50 = vld [vmem:[#allocation4 + $0x2c4] ss:$16 sps:$4 sm:$0xff]  }
  0xae   :  { %2295 = vmatprep.subr.bf16.mxu0 %v3823_v52  ;;  %v3857_v52 = vld [vmem:[#allocation4 + $0x2c0] ss:$16 sps:$4 sm:$0xff]  }
  0xaf   :  { %672 = vmatmul.mubr.bf16.vlgmr.msra.gmra.mrb[8].mxu1 %v4431_v1  ;;  %v3766_v1 = vld [vmem:[#allocation4 + $0xcc] ss:$16 sps:$4 sm:$0xff]  }
  0xb0   :  { %2419 = vmatpush1.bf16.msra.mxu1 %v3728_v34 }
  0xb1   :  { %2420 = vmatprep.subr.bf16.mxu1 %v3736_v35  ;;  %v3833_v35 = vld [vmem:[#allocation4 + $0x240] ss:$16 sps:$4 sm:$0xff]  }
  0xb4   :  { %2421 = vmatpush1.bf16.msra.mxu1 %v3734_v36  ;;  %v3836_v36 = vld [vmem:[#allocation4 + $0x248] ss:$16 sps:$4 sm:$0xff]  }
  0xb5   :  { %2422 = vmatprep.subr.bf16.mxu1 %v3742_v37 }
  0xb8   :  { %2423 = vmatpush1.bf16.msra.mxu1 %v3740_v38  ;;  %v3841_v38 = vld [vmem:[#allocation4 + $0x264] ss:$16 sps:$4 sm:$0xff]  }
  0xb9   :  { %2424 = vmatprep.subr.bf16.mxu1 %v3748_v39  ;;  %v3844_v39 = vld [vmem:[#allocation4 + $0x26c] ss:$16 sps:$4 sm:$0xff]  }
  0xbc   :  { %2425 = vmatpush1.bf16.msra.mxu1 %v3746_v40  ;;  %v3839_v40 = vld [vmem:[#allocation4 + $0x260] ss:$16 sps:$4 sm:$0xff]  }
  0xbd   :  { %2426 = vmatprep.subr.bf16.mxu1 %v3754_v41  ;;  %v3842_v41 = vld [vmem:[#allocation4 + $0x268] ss:$16 sps:$4 sm:$0xff]  }
  0xc0   :  { %2427 = vmatpush1.bf16.msra.mxu1 %v3752_v42  ;;  %v3847_v42 = vld [vmem:[#allocation4 + $0x284] ss:$16 sps:$4 sm:$0xff]  }
  0xc1   :  { %2428 = vmatprep.subr.bf16.mxu1 %v3760_v43  ;;  %v3850_v43 = vld [vmem:[#allocation4 + $0x28c] ss:$16 sps:$4 sm:$0xff]  }
  0xc4   :  { %2429 = vmatpush1.bf16.msra.mxu1 %v3758_v44  ;;  %v3845_v44 = vld [vmem:[#allocation4 + $0x280] ss:$16 sps:$4 sm:$0xff]  }
  0xc5   :  { %2430 = vmatprep.subr.bf16.mxu1 %v3766_v1  ;;  %v3853_v1 = vld [vmem:[#allocation4 + $0x2a4] ss:$16 sps:$4 sm:$0xff]  }
  0xc8   :  { %2431 = vmatpush1.bf16.msra.mxu1 %v3764_v47  ;;  %v3851_v47 = vld [vmem:[#allocation4 + $0x2a0] ss:$16 sps:$4 sm:$0xff]  }
  0xc9   :  { %2432 = vmatprep.subr.bf16.mxu1 %v3772_v49  ;;  %v170_v49 = vsub.s32 3, %v4439_v9 }
  0xcc   :  { %2433 = vmatpush1.bf16.msra.mxu1 %v3770_v51  ;;  %v3862_v51 = vld [vmem:[#allocation4 + $0x2cc] ss:$16 sps:$4 sm:$0xff]  }
  0xcd   :  { %2434 = vmatprep.subr.bf16.mxu1 %v3778_v53  ;;  %v3860_v53 = vld [vmem:[#allocation4 + $0x2c8] ss:$16 sps:$4 sm:$0xff]  }
  0xd0   :  { %2435 = vmatpush1.bf16.msra.mxu1 %v3776_v54  ;;  %v171_v54 = vrot.slane %v4447_v11, %v170_v49 }
  0xd1   :  { %2436 = vmatprep.subr.bf16.mxu1 %v3784_v55  ;;  %v3865_v55 = vld [vmem:[#allocation4 + $0x2e4] ss:$16 sps:$4 sm:$0xff]  }
  0xd4   :  { %2437 = vmatpush1.bf16.msra.mxu1 %v3782_v56  ;;  %v3868_v56 = vld [vmem:[#allocation4 + $0x2ec] ss:$16 sps:$4 sm:$0xff]  }
  0xd5   :  { %2438 = vmatprep.subr.bf16.mxu1 %v3790_v57 }
  0xd8   :  { %2439 = vmatpush1.bf16.msra.mxu1 %v3788_v58 }
  0xd9   :  { %2440 = vmatprep.subr.bf16.mxu1 %v3796_v59  ;;  %v3863_v59 = vld [vmem:[#allocation4 + $0x2e0] ss:$16 sps:$4 sm:$0xff]  }
  0xdc   :  { %2441 = vmatpush1.bf16.msra.mxu1 %v3794_v60  ;;  %v3866_v60 = vld [vmem:[#allocation4 + $0x2e8] ss:$16 sps:$4 sm:$0xff]  }
  0xdd   :  { %2442 = vmatprep.subr.bf16.mxu1 %v3802_v61 }
  0xe0   :  { %2443 = vmatpush1.bf16.msra.mxu1 %v3800_v62 }
  0xe1   :  { %2444 = vmatprep.subr.bf16.mxu1 %v3808_v63  ;;  %v3871_v63 = vld [vmem:[#allocation4 + $0x304] ss:$16 sps:$4 sm:$0xff]  }
  0xe4   :  { %2445 = vmatpush1.bf16.msra.mxu1 %v3806_v2  ;;  %v3874_v2 = vld [vmem:[#allocation4 + $0x30c] ss:$16 sps:$4 sm:$0xff]  }
  0xe5   :  { %2446 = vmatprep.subr.bf16.mxu1 %v3814_v3 }
  0xe8   :  { %2447 = vmatpush1.bf16.msra.mxu1 %v3812_v4 }
  0xe9   :  { %2448 = vmatprep.subr.bf16.mxu1 %v3820_v5  ;;  %v3869_v5 = vld [vmem:[#allocation4 + $0x300] ss:$16 sps:$4 sm:$0xff]  }
  0xec   :  { %2449 = vmatpush1.bf16.msra.mxu1 %v3818_v6  ;;  %v3872_v6 = vld [vmem:[#allocation4 + $0x308] ss:$16 sps:$4 sm:$0xff]  }
  0xed   :  { %2459 = vmatprep.subr.bf16.mxu1 %v3826_v7 }
 0x142   :  { %v550_v14 = vpop.f32.mrb[0].mxu1  ;;  %v4456_v32 = vpop.f32.mrb[0].mxu0 }
 0x143   :  { %v551_v15 = vadd.f32 %v550_v14, %v159_v12  ;;  %v552_v16 = vpop.f32.mrb[1].mxu1  ;;  %v4458_v33 = vpop.f32.mrb[1].mxu0  ;;  %v3880_v12 = vld [vmem:[#allocation4 + $0x32c] ss:$16 sps:$4 sm:$0xff]   ;;  %v3878_v14 = vld [vmem:[#allocation4 + $0x328] ss:$16 sps:$4 sm:$0xff]  }
 0x144   :  { %v553_v17 = vadd.f32 %v552_v16, %v163_v13  ;;  %v554_v18 = vpop.f32.mrb[2].mxu1  ;;  %v636_v34 = vpop.f32.mrb[2].mxu0  ;;  %v3875_v13 = vld [vmem:[#allocation4 + $0x320] ss:$16 sps:$4 sm:$0xff]   ;;  %v3886_v16 = vld [vmem:[#allocation4 + $0x34c] ss:$16 sps:$4 sm:$0xff]  }
 0x145   :  { %v680_v19 = vmax.f32 %v551_v15, 0.0  ;;  %v555_v20 = vpop.f32.mrb[3].mxu1  ;;  %v637_v37 = vpop.f32.mrb[3].mxu0  ;;  %v3883_v15 = vld [vmem:[#allocation4 + $0x344] ss:$16 sps:$4 sm:$0xff]  }
 0x146   :  { %v681_v21 = vmax.f32 %v553_v17, 0.0  ;;  %v3881_v17 = vld [vmem:[#allocation4 + $0x340] ss:$16 sps:$4 sm:$0xff]   ;;  %v3884_v18 = vld [vmem:[#allocation4 + $0x348] ss:$16 sps:$4 sm:$0xff]  }
 0x147   :  { %v688_v25 = vpack.c.bf16 %v680_v19, %v680_v19  ;;  %v3889_v19 = vld [vmem:[#allocation4 + $0x364] ss:$16 sps:$4 sm:$0xff]   ;;  %v3892_v20 = vld [vmem:[#allocation4 + $0x36c] ss:$16 sps:$4 sm:$0xff]   ;;  %v3899_v34 = vld [vmem:[#allocation4 + $0x3a0] ss:$16 sps:$4 sm:$0xff]  }
 0x148   :  { %v689_v22 = vpack.c.bf16 %v681_v21, %v681_v21  ;;  %v3887_v21 = vld [vmem:[#allocation4 + $0x360] ss:$16 sps:$4 sm:$0xff]   ;;  %v3910_v37 = vld [vmem:[#allocation4 + $0x3cc] ss:$16 sps:$4 sm:$0xff]  }
 0x14a   :  { %2286 = vmatprep.mubr.bf16.mxu0 %v689_v22  ;;  %2450 = vmatprep.mubr.bf16.mxu1 %v689_v22  ;;  %v3890_v22 = vld [vmem:[#allocation4 + $0x368] ss:$16 sps:$4 sm:$0xff]  }
 0x14b   :  { %2287 = vmatmul.mubr.bf16.vlgmr.msra.gmra.mrb[4].mxu0 %v688_v25  ;;  %2451 = vmatmul.mubr.bf16.vlgmr.msra.gmra.mrb[12].mxu1 %v688_v25  ;;  %v166_v25 = vsub.s32 2, %v4439_v9 }
 0x14c   :  { %2296 = vmatpush1.bf16.msra.mxu0 %v3821_v23  ;;  %2460 = vmatpush1.bf16.msra.mxu1 %v3824_v24  ;;  %v3895_v23 = vld [vmem:[#allocation4 + $0x384] ss:$16 sps:$4 sm:$0xff]   ;;  %v3898_v24 = vld [vmem:[#allocation4 + $0x38c] ss:$16 sps:$4 sm:$0xff]  }
 0x14d   :  { %2297 = vmatprep.subr.bf16.mxu0 %v3829_v26  ;;  %2461 = vmatprep.subr.bf16.mxu1 %v3832_v27  ;;  %v3893_v26 = vld [vmem:[#allocation4 + $0x380] ss:$16 sps:$4 sm:$0xff]   ;;  %v3896_v27 = vld [vmem:[#allocation4 + $0x388] ss:$16 sps:$4 sm:$0xff]  }
 0x150   :  { %2298 = vmatpush1.bf16.msra.mxu0 %v3827_v28  ;;  %2462 = vmatpush1.bf16.msra.mxu1 %v3830_v29  ;;  %v3901_v28 = vld [vmem:[#allocation4 + $0x3a4] ss:$16 sps:$4 sm:$0xff]   ;;  %v3904_v29 = vld [vmem:[#allocation4 + $0x3ac] ss:$16 sps:$4 sm:$0xff]  }
 0x151   :  { %2299 = vmatprep.subr.bf16.mxu0 %v3835_v30  ;;  %2463 = vmatprep.subr.bf16.mxu1 %v3838_v31  ;;  %v178_v30 = vsub.s32 5, %v4439_v9  ;;  %v167_v31 = vrot.slane %v4447_v11, %v166_v25 }
 0x154   :  { %2300 = vmatpush1.bf16.msra.mxu0 %v3833_v35  ;;  %2464 = vmatpush1.bf16.msra.mxu1 %v3836_v36  ;;  %v3902_v35 = vld [vmem:[#allocation4 + $0x3a8] ss:$16 sps:$4 sm:$0xff]   ;;  %v3907_v36 = vld [vmem:[#allocation4 + $0x3c4] ss:$16 sps:$4 sm:$0xff]  }
 0x155   :  { %2301 = vmatprep.subr.bf16.mxu0 %v3841_v38  ;;  %2465 = vmatprep.subr.bf16.mxu1 %v3844_v39  ;;  %v179_v38 = vrot.slane %v4447_v11, %v178_v30  ;;  %v3965_v30 = vld [vmem:[#allocation4 + $0x500] ss:$16 sps:$4 sm:$0xff]  }
 0x158   :  { %2302 = vmatpush1.bf16.msra.mxu0 %v3839_v40  ;;  %2466 = vmatpush1.bf16.msra.mxu1 %v3842_v41  ;;  %v3905_v40 = vld [vmem:[#allocation4 + $0x3c0] ss:$16 sps:$4 sm:$0xff]   ;;  %v3908_v41 = vld [vmem:[#allocation4 + $0x3c8] ss:$16 sps:$4 sm:$0xff]  }
 0x159   :  { %2303 = vmatprep.subr.bf16.mxu0 %v3847_v42  ;;  %2467 = vmatprep.subr.bf16.mxu1 %v3850_v43  ;;  %v3913_v42 = vld [vmem:[#allocation4 + $0x3e4] ss:$16 sps:$4 sm:$0xff]   ;;  %v3916_v43 = vld [vmem:[#allocation4 + $0x3ec] ss:$16 sps:$4 sm:$0xff]  }
 0x15c   :  { %2304 = vmatpush1.bf16.msra.mxu0 %v3845_v44  ;;  %2468 = vmatpush1.bf16.msra.mxu1 %v3848_v45  ;;  %v635_v44 = vadd.f32 %v4458_v33, %v179_v38  ;;  %v3917_v33 = vld [vmem:[#allocation4 + $0x400] ss:$16 sps:$4 sm:$0xff]   ;;  %v3979_v38 = vld [vmem:[#allocation4 + $0x544] ss:$16 sps:$4 sm:$0xff]  }
 0x15d   :  { %2305 = vmatprep.subr.bf16.mxu0 %v3853_v1  ;;  %2469 = vmatprep.subr.bf16.mxu1 %v3856_v46 }
 0x160   :  { %2306 = vmatpush1.bf16.msra.mxu0 %v3851_v47  ;;  %2470 = vmatpush1.bf16.msra.mxu1 %v3854_v48  ;;  %v3911_v47 = vld [vmem:[#allocation4 + $0x3e0] ss:$16 sps:$4 sm:$0xff]   ;;  %v3914_v48 = vld [vmem:[#allocation4 + $0x3e8] ss:$16 sps:$4 sm:$0xff]  }
 0x161   :  { %2307 = vmatprep.subr.bf16.mxu0 %v3859_v50  ;;  %2471 = vmatprep.subr.bf16.mxu1 %v3862_v51  ;;  %v3919_v51 = vld [vmem:[#allocation4 + $0x404] ss:$16 sps:$4 sm:$0xff]  }
 0x162   :  { %v4464_v57 = vpop.f32.mrb[4].mxu1 }
 0x163   :  { %v593_v58 = vpop.f32.mrb[5].mxu1  ;;  %v592_v39 = vadd.f32 %v4464_v57, %v167_v31  ;;  %v3925_v57 = vld [vmem:[#allocation4 + $0x424] ss:$16 sps:$4 sm:$0xff]   ;;  %v3968_v31 = vld [vmem:[#allocation4 + $0x508] ss:$16 sps:$4 sm:$0xff]  }
 0x164   :  { %2308 = vmatpush1.bf16.msra.mxu0 %v3857_v52  ;;  %2472 = vmatpush1.bf16.msra.mxu1 %v3860_v53  ;;  %v594_v61 = vadd.f32 %v593_v58, %v171_v54  ;;  %v595_v62 = vpop.f32.mrb[6].mxu1  ;;  %v3922_v52 = vld [vmem:[#allocation4 + $0x40c] ss:$16 sps:$4 sm:$0xff]   ;;  %v685_v54 = vmax.f32 %v635_v44, 0.0  ;;  %v3983_v44 = vld [vmem:[#allocation4 + $0x560] ss:$16 sps:$4 sm:$0xff]  }
 0x165   :  { %2309 = vmatprep.subr.bf16.mxu0 %v3865_v55  ;;  %2473 = vmatprep.subr.bf16.mxu1 %v3868_v56  ;;  %v596_v3 = vpop.f32.mrb[7].mxu1  ;;  %v682_v1 = vmax.f32 %v592_v39, 0.0  ;;  %v3920_v56 = vld [vmem:[#allocation4 + $0x408] ss:$16 sps:$4 sm:$0xff]   ;;  %v3928_v58 = vld [vmem:[#allocation4 + $0x42c] ss:$16 sps:$4 sm:$0xff]  }
 0x166   :  { %v683_v4 = vmax.f32 %v594_v61, 0.0  ;;  %v3926_v61 = vld [vmem:[#allocation4 + $0x428] ss:$16 sps:$4 sm:$0xff]   ;;  %v3931_v62 = vld [vmem:[#allocation4 + $0x444] ss:$16 sps:$4 sm:$0xff]  }
 0x167   :  { %v690_v55 = vpack.c.bf16 %v682_v1, %v682_v1  ;;  %v3932_v3 = vld [vmem:[#allocation4 + $0x448] ss:$16 sps:$4 sm:$0xff]   ;;  %v3982_v39 = vld [vmem:[#allocation4 + $0x54c] ss:$16 sps:$4 sm:$0xff]  }
 0x168   :  { %2310 = vmatpush1.bf16.msra.mxu0 %v3863_v59  ;;  %2474 = vmatpush1.bf16.msra.mxu1 %v3866_v60  ;;  %v691_v7 = vpack.c.bf16 %v683_v4, %v683_v4  ;;  %v693_v59 = vpack.c.bf16 %v685_v54, %v685_v54  ;;  %v3923_v60 = vld [vmem:[#allocation4 + $0x420] ss:$16 sps:$4 sm:$0xff]   ;;  %v3937_v4 = vld [vmem:[#allocation4 + $0x464] ss:$16 sps:$4 sm:$0xff]   ;;  %v3986_v1 = vld [vmem:[#allocation4 + $0x568] ss:$16 sps:$4 sm:$0xff]  }
 0x169   :  { %2311 = vmatprep.subr.bf16.mxu0 %v3871_v63  ;;  %2475 = vmatprep.subr.bf16.mxu1 %v3874_v2  ;;  %v3934_v63 = vld [vmem:[#allocation4 + $0x44c] ss:$16 sps:$4 sm:$0xff]   ;;  %v3929_v2 = vld [vmem:[#allocation4 + $0x440] ss:$16 sps:$4 sm:$0xff]  }
 0x16a   :  { %2327 = vmatprep.mubr.bf16.mxu0 %v691_v7  ;;  %2491 = vmatprep.mubr.bf16.mxu1 %v691_v7  ;;  %v3938_v7 = vld [vmem:[#allocation4 + $0x468] ss:$16 sps:$4 sm:$0xff]   ;;  %v4000_v54 = vld [vmem:[#allocation4 + $0x5ac] ss:$16 sps:$4 sm:$0xff]  }
 0x16c   :  { %2312 = vmatpush1.bf16.msra.mxu0 %v3869_v5  ;;  %2476 = vmatpush1.bf16.msra.mxu1 %v3872_v6  ;;  %v3940_v5 = vld [vmem:[#allocation4 + $0x46c] ss:$16 sps:$4 sm:$0xff]   ;;  %v3935_v6 = vld [vmem:[#allocation4 + $0x460] ss:$16 sps:$4 sm:$0xff]  }
 0x16d   :  { %2313 = vmatprep.subr.bf16.mxu0 %v3877_v8  ;;  %2477 = vmatprep.subr.bf16.mxu1 %v3880_v12  ;;  %v3943_v8 = vld [vmem:[#allocation4 + $0x484] ss:$16 sps:$4 sm:$0xff]   ;;  %v3946_v12 = vld [vmem:[#allocation4 + $0x48c] ss:$16 sps:$4 sm:$0xff]  }
 0x170   :  { %2314 = vmatpush1.bf16.msra.mxu0 %v3875_v13  ;;  %2478 = vmatpush1.bf16.msra.mxu1 %v3878_v14  ;;  %v3941_v13 = vld [vmem:[#allocation4 + $0x480] ss:$16 sps:$4 sm:$0xff]   ;;  %v3944_v14 = vld [vmem:[#allocation4 + $0x488] ss:$16 sps:$4 sm:$0xff]  }
 0x171   :  { %2315 = vmatprep.subr.bf16.mxu0 %v3883_v15  ;;  %2479 = vmatprep.subr.bf16.mxu1 %v3886_v16  ;;  %v3949_v15 = vld [vmem:[#allocation4 + $0x4a4] ss:$16 sps:$4 sm:$0xff]   ;;  %v3952_v16 = vld [vmem:[#allocation4 + $0x4ac] ss:$16 sps:$4 sm:$0xff]  }
 0x174   :  { %2316 = vmatpush1.bf16.msra.mxu0 %v3881_v17  ;;  %2480 = vmatpush1.bf16.msra.mxu1 %v3884_v18  ;;  %v3947_v17 = vld [vmem:[#allocation4 + $0x4a0] ss:$16 sps:$4 sm:$0xff]   ;;  %v3950_v18 = vld [vmem:[#allocation4 + $0x4a8] ss:$16 sps:$4 sm:$0xff]  }
 0x175   :  { %2317 = vmatprep.subr.bf16.mxu0 %v3889_v19  ;;  %2481 = vmatprep.subr.bf16.mxu1 %v3892_v20  ;;  %v3955_v19 = vld [vmem:[#allocation4 + $0x4c4] ss:$16 sps:$4 sm:$0xff]   ;;  %v3958_v20 = vld [vmem:[#allocation4 + $0x4cc] ss:$16 sps:$4 sm:$0xff]  }
 0x178   :  { %2318 = vmatpush1.bf16.msra.mxu0 %v3887_v21  ;;  %2482 = vmatpush1.bf16.msra.mxu1 %v3890_v22  ;;  %v3953_v21 = vld [vmem:[#allocation4 + $0x4c0] ss:$16 sps:$4 sm:$0xff]   ;;  %v3956_v22 = vld [vmem:[#allocation4 + $0x4c8] ss:$16 sps:$4 sm:$0xff]  }
 0x179   :  { %2319 = vmatprep.subr.bf16.mxu0 %v3895_v23  ;;  %2483 = vmatprep.subr.bf16.mxu1 %v3898_v24  ;;  %v3961_v23 = vld [vmem:[#allocation4 + $0x4e4] ss:$16 sps:$4 sm:$0xff]   ;;  %v3964_v24 = vld [vmem:[#allocation4 + $0x4ec] ss:$16 sps:$4 sm:$0xff]  }
 0x17c   :  { %2320 = vmatpush1.bf16.msra.mxu0 %v3893_v26  ;;  %2484 = vmatpush1.bf16.msra.mxu1 %v3896_v27  ;;  %v3959_v26 = vld [vmem:[#allocation4 + $0x4e0] ss:$16 sps:$4 sm:$0xff]   ;;  %v3962_v27 = vld [vmem:[#allocation4 + $0x4e8] ss:$16 sps:$4 sm:$0xff]  }
 0x17d   :  { %2321 = vmatprep.subr.bf16.mxu0 %v3901_v28  ;;  %2485 = vmatprep.subr.bf16.mxu1 %v3904_v29  ;;  %v3967_v28 = vld [vmem:[#allocation4 + $0x504] ss:$16 sps:$4 sm:$0xff]   ;;  %v3970_v29 = vld [vmem:[#allocation4 + $0x50c] ss:$16 sps:$4 sm:$0xff]  }
 0x180   :  { %2322 = vmatpush1.bf16.msra.mxu0 %v3899_v34  ;;  %2486 = vmatpush1.bf16.msra.mxu1 %v3902_v35  ;;  %v3973_v34 = vld [vmem:[#allocation4 + $0x524] ss:$16 sps:$4 sm:$0xff]   ;;  %v3976_v35 = vld [vmem:[#allocation4 + $0x52c] ss:$16 sps:$4 sm:$0xff]  }
 0x181   :  { %2323 = vmatprep.subr.bf16.mxu0 %v3907_v36  ;;  %2487 = vmatprep.subr.bf16.mxu1 %v3910_v37  ;;  %v3971_v36 = vld [vmem:[#allocation4 + $0x520] ss:$16 sps:$4 sm:$0xff]   ;;  %v3974_v37 = vld [vmem:[#allocation4 + $0x528] ss:$16 sps:$4 sm:$0xff]  }
 0x182   :  { %v4474_v45 = vpop.f32.mrb[8].mxu1 }
 0x183   :  { %v4476_v46 = vpop.f32.mrb[9].mxu1 }
 0x184   :  { %2324 = vmatpush1.bf16.msra.mxu0 %v3905_v40  ;;  %2488 = vmatpush1.bf16.msra.mxu1 %v3908_v41  ;;  %v677_v50 = vpop.f32.mrb[10].mxu1  ;;  %v3977_v40 = vld [vmem:[#allocation4 + $0x540] ss:$16 sps:$4 sm:$0xff]   ;;  %v3980_v41 = vld [vmem:[#allocation4 + $0x548] ss:$16 sps:$4 sm:$0xff]  }
 0x185   :  { %2325 = vmatprep.subr.bf16.mxu0 %v3913_v42  ;;  %2489 = vmatprep.subr.bf16.mxu1 %v3916_v43  ;;  %v678_v53 = vpop.f32.mrb[11].mxu1  ;;  %v3985_v42 = vld [vmem:[#allocation4 + $0x564] ss:$16 sps:$4 sm:$0xff]   ;;  %v3988_v43 = vld [vmem:[#allocation4 + $0x56c] ss:$16 sps:$4 sm:$0xff]   ;;  %v174_v50 = vsub.s32 4, %v4439_v9 }
 0x186   :  { %v3997_v53 = vld [vmem:[#allocation4 + $0x5a4] ss:$16 sps:$4 sm:$0xff]  }
 0x188   :  { %2326 = vmatpush1.bf16.msra.mxu0 %v3911_v47  ;;  %2490 = vmatpush1.bf16.msra.mxu1 %v3914_v48  ;;  %v3991_v47 = vld [vmem:[#allocation4 + $0x584] ss:$16 sps:$4 sm:$0xff]   ;;  %v3994_v48 = vld [vmem:[#allocation4 + $0x58c] ss:$16 sps:$4 sm:$0xff]  }
 0x189   :  { %2336 = vmatprep.subr.bf16.mxu0 %v3919_v51  ;;  %2500 = vmatprep.subr.bf16.mxu1 %v3922_v52  ;;  %v3989_v51 = vld [vmem:[#allocation4 + $0x580] ss:$16 sps:$4 sm:$0xff]   ;;  %v3992_v52 = vld [vmem:[#allocation4 + $0x588] ss:$16 sps:$4 sm:$0xff]  }
 0x18b   :  { %2328 = vmatmul.mubr.bf16.vlgmr.msra.gmra.mrb[4].mxu0 %v690_v55  ;;  %2492 = vmatmul.mubr.bf16.vlgmr.msra.gmra.mrb[12].mxu1 %v690_v55  ;;  %v186_v55 = vsub.s32 7, %v4439_v9 }
 0x18c   :  { %2337 = vmatpush1.bf16.msra.mxu0 %v3917_v33  ;;  %2501 = vmatpush1.bf16.msra.mxu1 %v3920_v56  ;;  %v175_v33 = vrot.slane %v4447_v11, %v174_v50  ;;  %v3995_v56 = vld [vmem:[#allocation4 + $0x5a0] ss:$16 sps:$4 sm:$0xff]   ;;  %v4066_v50 = vld [vmem:[#allocation4 + $0x70c] ss:$16 sps:$4 sm:$0xff]  }
 0x18d   :  { %2338 = vmatprep.subr.bf16.mxu0 %v3925_v57  ;;  %2502 = vmatprep.subr.bf16.mxu1 %v3928_v58  ;;  %v3998_v57 = vld [vmem:[#allocation4 + $0x5a8] ss:$16 sps:$4 sm:$0xff]   ;;  %v4003_v58 = vld [vmem:[#allocation4 + $0x5c4] ss:$16 sps:$4 sm:$0xff]  }
 0x18e   :  { %2368 = vmatprep.mubr.bf16.mxu0 %v693_v59  ;;  %2532 = vmatprep.mubr.bf16.mxu1 %v693_v59  ;;  %v4006_v59 = vld [vmem:[#allocation4 + $0x5cc] ss:$16 sps:$4 sm:$0xff]  }
 0x190   :  { %2339 = vmatpush1.bf16.msra.mxu0 %v3923_v60  ;;  %2503 = vmatpush1.bf16.msra.mxu1 %v3926_v61  ;;  %v187_v60 = vrot.slane %v4447_v11, %v186_v55  ;;  %v633_v61 = vadd.f32 %v4456_v32, %v175_v33  ;;  %v4067_v55 = vld [vmem:[#allocation4 + $0x720] ss:$16 sps:$4 sm:$0xff]   ;;  %v4070_v33 = vld [vmem:[#allocation4 + $0x728] ss:$16 sps:$4 sm:$0xff]  }
 0x191   :  { %2340 = vmatprep.subr.bf16.mxu0 %v3931_v62  ;;  %2504 = vmatprep.subr.bf16.mxu1 %v3934_v63  ;;  %v4001_v62 = vld [vmem:[#allocation4 + $0x5c0] ss:$16 sps:$4 sm:$0xff]   ;;  %v4004_v63 = vld [vmem:[#allocation4 + $0x5c8] ss:$16 sps:$4 sm:$0xff]  }
 0x194   :  { %2341 = vmatpush1.bf16.msra.mxu0 %v3929_v2  ;;  %2505 = vmatpush1.bf16.msra.mxu1 %v3932_v3  ;;  %v4009_v2 = vld [vmem:[#allocation4 + $0x5e4] ss:$16 sps:$4 sm:$0xff]   ;;  %v4012_v3 = vld [vmem:[#allocation4 + $0x5ec] ss:$16 sps:$4 sm:$0xff]  }
 0x195   :  { %2342 = vmatprep.subr.bf16.mxu0 %v3937_v4  ;;  %2506 = vmatprep.subr.bf16.mxu1 %v3940_v5  ;;  %v676_v4 = vadd.f32 %v4476_v46, %v187_v60  ;;  %v684_v5 = vmax.f32 %v633_v61, 0.0  ;;  %v4081_v60 = vld [vmem:[#allocation4 + $0x764] ss:$16 sps:$4 sm:$0xff]   ;;  %v4084_v61 = vld [vmem:[#allocation4 + $0x76c] ss:$16 sps:$4 sm:$0xff]  }
 0x197   :  { %v687_v32 = vmax.f32 %v676_v4, 0.0  ;;  %v4085_v4 = vld [vmem:[#allocation4 + $0x780] ss:$16 sps:$4 sm:$0xff]  }
 0x198   :  { %2343 = vmatpush1.bf16.msra.mxu0 %v3935_v6  ;;  %2507 = vmatpush1.bf16.msra.mxu1 %v3938_v7  ;;  %v4007_v6 = vld [vmem:[#allocation4 + $0x5e0] ss:$16 sps:$4 sm:$0xff]   ;;  %v4010_v7 = vld [vmem:[#allocation4 + $0x5e8] ss:$16 sps:$4 sm:$0xff]  }
 0x199   :  { %2344 = vmatprep.subr.bf16.mxu0 %v3943_v8  ;;  %2508 = vmatprep.subr.bf16.mxu1 %v3946_v12  ;;  %v4015_v8 = vld [vmem:[#allocation4 + $0x604] ss:$16 sps:$4 sm:$0xff]   ;;  %v4018_v12 = vld [vmem:[#allocation4 + $0x60c] ss:$16 sps:$4 sm:$0xff]   ;;  %v695_v46 = vpack.c.bf16 %v687_v32, %v687_v32  ;;  %v4094_v32 = vld [vmem:[#allocation4 + $0x7a8] ss:$16 sps:$4 sm:$0xff]  }
 0x19c   :  { %2345 = vmatpush1.bf16.msra.mxu0 %v3941_v13  ;;  %2509 = vmatpush1.bf16.msra.mxu1 %v3944_v14  ;;  %v692_v13 = vpack.c.bf16 %v684_v5, %v684_v5  ;;  %v4013_v14 = vld [vmem:[#allocation4 + $0x600] ss:$16 sps:$4 sm:$0xff]   ;;  %v4088_v5 = vld [vmem:[#allocation4 + $0x788] ss:$16 sps:$4 sm:$0xff]  }
 0x19d   :  { %2346 = vmatprep.subr.bf16.mxu0 %v3949_v15  ;;  %2510 = vmatprep.subr.bf16.mxu1 %v3952_v16  ;;  %v4016_v15 = vld [vmem:[#allocation4 + $0x608] ss:$16 sps:$4 sm:$0xff]   ;;  %v4021_v16 = vld [vmem:[#allocation4 + $0x624] ss:$16 sps:$4 sm:$0xff]  }
 0x1a0   :  { %2347 = vmatpush1.bf16.msra.mxu0 %v3947_v17  ;;  %2511 = vmatpush1.bf16.msra.mxu1 %v3950_v18  ;;  %v4024_v17 = vld [vmem:[#allocation4 + $0x62c] ss:$16 sps:$4 sm:$0xff]   ;;  %v4019_v18 = vld [vmem:[#allocation4 + $0x620] ss:$16 sps:$4 sm:$0xff]  }
 0x1a1   :  { %2348 = vmatprep.subr.bf16.mxu0 %v3955_v19  ;;  %2512 = vmatprep.subr.bf16.mxu1 %v3958_v20  ;;  %v4022_v19 = vld [vmem:[#allocation4 + $0x628] ss:$16 sps:$4 sm:$0xff]   ;;  %v4027_v20 = vld [vmem:[#allocation4 + $0x644] ss:$16 sps:$4 sm:$0xff]  }
 0x1a4   :  { %2349 = vmatpush1.bf16.msra.mxu0 %v3953_v21  ;;  %2513 = vmatpush1.bf16.msra.mxu1 %v3956_v22  ;;  %v4030_v21 = vld [vmem:[#allocation4 + $0x64c] ss:$16 sps:$4 sm:$0xff]   ;;  %v4025_v22 = vld [vmem:[#allocation4 + $0x640] ss:$16 sps:$4 sm:$0xff]  }
 0x1a5   :  { %2350 = vmatprep.subr.bf16.mxu0 %v3961_v23  ;;  %2514 = vmatprep.subr.bf16.mxu1 %v3964_v24  ;;  %v4028_v23 = vld [vmem:[#allocation4 + $0x648] ss:$16 sps:$4 sm:$0xff]   ;;  %v4033_v24 = vld [vmem:[#allocation4 + $0x664] ss:$16 sps:$4 sm:$0xff]  }
 0x1a8   :  { %2351 = vmatpush1.bf16.msra.mxu0 %v3959_v26  ;;  %2515 = vmatpush1.bf16.msra.mxu1 %v3962_v27  ;;  %v4036_v26 = vld [vmem:[#allocation4 + $0x66c] ss:$16 sps:$4 sm:$0xff]   ;;  %v4031_v27 = vld [vmem:[#allocation4 + $0x660] ss:$16 sps:$4 sm:$0xff]  }
 0x1a9   :  { %2352 = vmatprep.subr.bf16.mxu0 %v3967_v28  ;;  %2516 = vmatprep.subr.bf16.mxu1 %v3970_v29  ;;  %v4034_v28 = vld [vmem:[#allocation4 + $0x668] ss:$16 sps:$4 sm:$0xff]   ;;  %v4039_v29 = vld [vmem:[#allocation4 + $0x684] ss:$16 sps:$4 sm:$0xff]  }
 0x1ac   :  { %2353 = vmatpush1.bf16.msra.mxu0 %v3965_v30  ;;  %2517 = vmatpush1.bf16.msra.mxu1 %v3968_v31  ;;  %v4042_v30 = vld [vmem:[#allocation4 + $0x68c] ss:$16 sps:$4 sm:$0xff]   ;;  %v4037_v31 = vld [vmem:[#allocation4 + $0x680] ss:$16 sps:$4 sm:$0xff]  }
 0x1ad   :  { %2354 = vmatprep.subr.bf16.mxu0 %v3973_v34  ;;  %2518 = vmatprep.subr.bf16.mxu1 %v3976_v35  ;;  %v4040_v34 = vld [vmem:[#allocation4 + $0x688] ss:$16 sps:$4 sm:$0xff]   ;;  %v4045_v35 = vld [vmem:[#allocation4 + $0x6a4] ss:$16 sps:$4 sm:$0xff]  }
 0x1b0   :  { %2355 = vmatpush1.bf16.msra.mxu0 %v3971_v36  ;;  %2519 = vmatpush1.bf16.msra.mxu1 %v3974_v37  ;;  %v4048_v36 = vld [vmem:[#allocation4 + $0x6ac] ss:$16 sps:$4 sm:$0xff]   ;;  %v4043_v37 = vld [vmem:[#allocation4 + $0x6a0] ss:$16 sps:$4 sm:$0xff]  }
 0x1b1   :  { %2356 = vmatprep.subr.bf16.mxu0 %v3979_v38  ;;  %2520 = vmatprep.subr.bf16.mxu1 %v3982_v39  ;;  %v4046_v38 = vld [vmem:[#allocation4 + $0x6a8] ss:$16 sps:$4 sm:$0xff]   ;;  %v4051_v39 = vld [vmem:[#allocation4 + $0x6c4] ss:$16 sps:$4 sm:$0xff]  }
 0x1b4   :  { %2357 = vmatpush1.bf16.msra.mxu0 %v3977_v40  ;;  %2521 = vmatpush1.bf16.msra.mxu1 %v3980_v41  ;;  %v4054_v40 = vld [vmem:[#allocation4 + $0x6cc] ss:$16 sps:$4 sm:$0xff]   ;;  %v4049_v41 = vld [vmem:[#allocation4 + $0x6c0] ss:$16 sps:$4 sm:$0xff]  }
 0x1b5   :  { %2358 = vmatprep.subr.bf16.mxu0 %v3985_v42  ;;  %2522 = vmatprep.subr.bf16.mxu1 %v3988_v43  ;;  %v4052_v42 = vld [vmem:[#allocation4 + $0x6c8] ss:$16 sps:$4 sm:$0xff]   ;;  %v4057_v43 = vld [vmem:[#allocation4 + $0x6e4] ss:$16 sps:$4 sm:$0xff]  }
 0x1b8   :  { %2359 = vmatpush1.bf16.msra.mxu0 %v3983_v44  ;;  %2523 = vmatpush1.bf16.msra.mxu1 %v3986_v1  ;;  %v4060_v44 = vld [vmem:[#allocation4 + $0x6ec] ss:$16 sps:$4 sm:$0xff]   ;;  %v4055_v1 = vld [vmem:[#allocation4 + $0x6e0] ss:$16 sps:$4 sm:$0xff]  }
 0x1b9   :  { %2360 = vmatprep.subr.bf16.mxu0 %v3991_v47  ;;  %2524 = vmatprep.subr.bf16.mxu1 %v3994_v48  ;;  %v4058_v47 = vld [vmem:[#allocation4 + $0x6e8] ss:$16 sps:$4 sm:$0xff]   ;;  %v4063_v48 = vld [vmem:[#allocation4 + $0x704] ss:$16 sps:$4 sm:$0xff]  }
 0x1bc   :  { %2361 = vmatpush1.bf16.msra.mxu0 %v3989_v51  ;;  %2525 = vmatpush1.bf16.msra.mxu1 %v3992_v52  ;;  %v4061_v51 = vld [vmem:[#allocation4 + $0x700] ss:$16 sps:$4 sm:$0xff]   ;;  %v4064_v52 = vld [vmem:[#allocation4 + $0x708] ss:$16 sps:$4 sm:$0xff]  }
 0x1bd   :  { %2362 = vmatprep.subr.bf16.mxu0 %v3997_v53  ;;  %2526 = vmatprep.subr.bf16.mxu1 %v4000_v54  ;;  %v4069_v53 = vld [vmem:[#allocation4 + $0x724] ss:$16 sps:$4 sm:$0xff]   ;;  %v4072_v54 = vld [vmem:[#allocation4 + $0x72c] ss:$16 sps:$4 sm:$0xff]  }
 0x1c0   :  { %2363 = vmatpush1.bf16.msra.mxu0 %v3995_v56  ;;  %2527 = vmatpush1.bf16.msra.mxu1 %v3998_v57  ;;  %v4075_v56 = vld [vmem:[#allocation4 + $0x744] ss:$16 sps:$4 sm:$0xff]   ;;  %v4078_v57 = vld [vmem:[#allocation4 + $0x74c] ss:$16 sps:$4 sm:$0xff]  }
 0x1c1   :  { %2364 = vmatprep.subr.bf16.mxu0 %v4003_v58  ;;  %2528 = vmatprep.subr.bf16.mxu1 %v4006_v59  ;;  %v4073_v58 = vld [vmem:[#allocation4 + $0x740] ss:$16 sps:$4 sm:$0xff]   ;;  %v4076_v59 = vld [vmem:[#allocation4 + $0x748] ss:$16 sps:$4 sm:$0xff]  }
 0x1c4   :  { %2365 = vmatpush1.bf16.msra.mxu0 %v4001_v62  ;;  %2529 = vmatpush1.bf16.msra.mxu1 %v4004_v63  ;;  %v4079_v62 = vld [vmem:[#allocation4 + $0x760] ss:$16 sps:$4 sm:$0xff]   ;;  %v4082_v63 = vld [vmem:[#allocation4 + $0x768] ss:$16 sps:$4 sm:$0xff]  }
 0x1c5   :  { %2366 = vmatprep.subr.bf16.mxu0 %v4009_v2  ;;  %2530 = vmatprep.subr.bf16.mxu1 %v4012_v3  ;;  %v4087_v2 = vld [vmem:[#allocation4 + $0x784] ss:$16 sps:$4 sm:$0xff]   ;;  %v4090_v3 = vld [vmem:[#allocation4 + $0x78c] ss:$16 sps:$4 sm:$0xff]  }
 0x1c8   :  { %2367 = vmatpush1.bf16.msra.mxu0 %v4007_v6  ;;  %2531 = vmatpush1.bf16.msra.mxu1 %v4010_v7  ;;  %v182_v6 = vsub.s32 6, %v4439_v9  ;;  %v4093_v7 = vld [vmem:[#allocation4 + $0x7a4] ss:$16 sps:$4 sm:$0xff]   ;;  %v4219_v9 = vld [vmem:[#allocation7 + $0x78] sm:$0xff]  }
 0x1c9   :  { %2377 = vmatprep.subr.bf16.mxu0 %v4015_v8  ;;  %2541 = vmatprep.subr.bf16.mxu1 %v4018_v12  ;;  %v4096_v8 = vld [vmem:[#allocation4 + $0x7ac] ss:$16 sps:$4 sm:$0xff]   ;;  %v4091_v12 = vld [vmem:[#allocation4 + $0x7a0] ss:$16 sps:$4 sm:$0xff]  }
 0x1cb   :  { %2369 = vmatmul.mubr.bf16.vlgmr.msra.gmra.mrb[4].mxu0 %v692_v13  ;;  %2533 = vmatmul.mubr.bf16.vlgmr.msra.gmra.mrb[12].mxu1 %v692_v13  ;;  %v183_v13 = vrot.slane %v4447_v11, %v182_v6  ;;  %v4111_v11 = vld [vmem:[#allocation6 + $0x4] ss:$8 sps:$4 sm:$0xff]  }
 0x1cc   :  { %2378 = vmatpush1.bf16.msra.mxu0 %v4013_v14  ;;  %2542 = vmatpush1.bf16.msra.mxu1 %v4016_v15  ;;  %v4099_v14 = vld [vmem:[#allocation4 + $0x7c4] ss:$16 sps:$4 sm:$0xff]   ;;  %v4102_v15 = vld [vmem:[#allocation4 + $0x7cc] ss:$16 sps:$4 sm:$0xff]  }
 0x1cd   :  { %2379 = vmatprep.subr.bf16.mxu0 %v4021_v16  ;;  %2543 = vmatprep.subr.bf16.mxu1 %v4024_v17  ;;  %v4097_v16 = vld [vmem:[#allocation4 + $0x7c0] ss:$16 sps:$4 sm:$0xff]   ;;  %v4100_v17 = vld [vmem:[#allocation4 + $0x7c8] ss:$16 sps:$4 sm:$0xff]  }
 0x1ce   :  { %2409 = vmatprep.mubr.bf16.mxu0 %v695_v46  ;;  %2573 = vmatprep.mubr.bf16.mxu1 %v695_v46  ;;  %v674_v46 = vadd.f32 %v4474_v45, %v183_v13  ;;  %v4112_v45 = vld [vmem:[#allocation6 + $0x10] ss:$8 sps:$4 sm:$0xff]   ;;  %v4214_v6 = vld [vmem:[#allocation7 + $0x20] sm:$0xff]  }
 0x1d0   :  { %2380 = vmatpush1.bf16.msra.mxu0 %v4019_v18  ;;  %2544 = vmatpush1.bf16.msra.mxu1 %v4022_v19  ;;  %v4105_v18 = vld [vmem:[#allocation4 + $0x7e4] ss:$16 sps:$4 sm:$0xff]   ;;  %v4108_v19 = vld [vmem:[#allocation4 + $0x7ec] ss:$16 sps:$4 sm:$0xff]  }
 0x1d1   :  { %2381 = vmatprep.subr.bf16.mxu0 %v4027_v20  ;;  %2545 = vmatprep.subr.bf16.mxu1 %v4030_v21  ;;  %v4103_v20 = vld [vmem:[#allocation4 + $0x7e0] ss:$16 sps:$4 sm:$0xff]   ;;  %v4106_v21 = vld [vmem:[#allocation4 + $0x7e8] ss:$16 sps:$4 sm:$0xff]  }
 0x1d4   :  { %2382 = vmatpush1.bf16.msra.mxu0 %v4025_v22  ;;  %2546 = vmatpush1.bf16.msra.mxu1 %v4028_v23  ;;  %v686_v22 = vmax.f32 %v674_v46, 0.0  ;;  %v4109_v23 = vld [vmem:[#allocation6] ss:$8 sps:$4 sm:$0xff]  }
 0x1d5   :  { %2383 = vmatprep.subr.bf16.mxu0 %v4033_v24  ;;  %2547 = vmatprep.subr.bf16.mxu1 %v4036_v26  ;;  %v4114_v26 = vld [vmem:[#allocation6 + $0x14] ss:$8 sps:$4 sm:$0xff]  }
 0x1d6   :  { %v694_v24 = vpack.c.bf16 %v686_v22, %v686_v22 }
 0x1d8   :  { %2384 = vmatpush1.bf16.msra.mxu0 %v4031_v27  ;;  %2548 = vmatpush1.bf16.msra.mxu1 %v4034_v28  ;;  %v4117_v27 = vld [vmem:[#allocation6 + $0x24] ss:$8 sps:$4 sm:$0xff]   ;;  %v4115_v28 = vld [vmem:[#allocation6 + $0x20] ss:$8 sps:$4 sm:$0xff]  }
 0x1d9   :  { %2385 = vmatprep.subr.bf16.mxu0 %v4039_v29  ;;  %2549 = vmatprep.subr.bf16.mxu1 %v4042_v30  ;;  %v4120_v29 = vld [vmem:[#allocation6 + $0x34] ss:$8 sps:$4 sm:$0xff]   ;;  %v4118_v30 = vld [vmem:[#allocation6 + $0x30] ss:$8 sps:$4 sm:$0xff]  }
 0x1dc   :  { %2386 = vmatpush1.bf16.msra.mxu0 %v4037_v31  ;;  %2550 = vmatpush1.bf16.msra.mxu1 %v4040_v34  ;;  %v4123_v31 = vld [vmem:[#allocation6 + $0x44] ss:$8 sps:$4 sm:$0xff]   ;;  %v4121_v34 = vld [vmem:[#allocation6 + $0x40] ss:$8 sps:$4 sm:$0xff]  }
 0x1dd   :  { %2387 = vmatprep.subr.bf16.mxu0 %v4045_v35  ;;  %2551 = vmatprep.subr.bf16.mxu1 %v4048_v36  ;;  %v4126_v35 = vld [vmem:[#allocation6 + $0x54] ss:$8 sps:$4 sm:$0xff]   ;;  %v4124_v36 = vld [vmem:[#allocation6 + $0x50] ss:$8 sps:$4 sm:$0xff]  }
 0x1e0   :  { %2388 = vmatpush1.bf16.msra.mxu0 %v4043_v37  ;;  %2552 = vmatpush1.bf16.msra.mxu1 %v4046_v38  ;;  %v4129_v37 = vld [vmem:[#allocation6 + $0x64] ss:$8 sps:$4 sm:$0xff]   ;;  %v4127_v38 = vld [vmem:[#allocation6 + $0x60] ss:$8 sps:$4 sm:$0xff]  }
 0x1e1   :  { %2389 = vmatprep.subr.bf16.mxu0 %v4051_v39  ;;  %2553 = vmatprep.subr.bf16.mxu1 %v4054_v40  ;;  %v4132_v39 = vld [vmem:[#allocation6 + $0x74] ss:$8 sps:$4 sm:$0xff]   ;;  %v4130_v40 = vld [vmem:[#allocation6 + $0x70] ss:$8 sps:$4 sm:$0xff]  }
 0x1e4   :  { %2390 = vmatpush1.bf16.msra.mxu0 %v4049_v41  ;;  %2554 = vmatpush1.bf16.msra.mxu1 %v4052_v42  ;;  %v4135_v41 = vld [vmem:[#allocation6 + $0x84] ss:$8 sps:$4 sm:$0xff]   ;;  %v4133_v42 = vld [vmem:[#allocation6 + $0x80] ss:$8 sps:$4 sm:$0xff]  }
 0x1e5   :  { %2391 = vmatprep.subr.bf16.mxu0 %v4057_v43  ;;  %2555 = vmatprep.subr.bf16.mxu1 %v4060_v44  ;;  %v4138_v43 = vld [vmem:[#allocation6 + $0x94] ss:$8 sps:$4 sm:$0xff]   ;;  %v4136_v44 = vld [vmem:[#allocation6 + $0x90] ss:$8 sps:$4 sm:$0xff]  }
 0x1e8   :  { %2392 = vmatpush1.bf16.msra.mxu0 %v4055_v1  ;;  %2556 = vmatpush1.bf16.msra.mxu1 %v4058_v47  ;;  %v4141_v1 = vld [vmem:[#allocation6 + $0xa4] ss:$8 sps:$4 sm:$0xff]   ;;  %v4139_v47 = vld [vmem:[#allocation6 + $0xa0] ss:$8 sps:$4 sm:$0xff]  }
 0x1e9   :  { %2393 = vmatprep.subr.bf16.mxu0 %v4063_v48  ;;  %2557 = vmatprep.subr.bf16.mxu1 %v4066_v50  ;;  %v4144_v48 = vld [vmem:[#allocation6 + $0xb4] ss:$8 sps:$4 sm:$0xff]   ;;  %v4142_v50 = vld [vmem:[#allocation6 + $0xb0] ss:$8 sps:$4 sm:$0xff]  }
 0x1ec   :  { %2394 = vmatpush1.bf16.msra.mxu0 %v4061_v51  ;;  %2558 = vmatpush1.bf16.msra.mxu1 %v4064_v52  ;;  %v4147_v51 = vld [vmem:[#allocation6 + $0xc4] ss:$8 sps:$4 sm:$0xff]   ;;  %v4145_v52 = vld [vmem:[#allocation6 + $0xc0] ss:$8 sps:$4 sm:$0xff]  }
 0x1ed   :  { %2395 = vmatprep.subr.bf16.mxu0 %v4069_v53  ;;  %2559 = vmatprep.subr.bf16.mxu1 %v4072_v54  ;;  %v4150_v53 = vld [vmem:[#allocation6 + $0xd4] ss:$8 sps:$4 sm:$0xff]   ;;  %v4148_v54 = vld [vmem:[#allocation6 + $0xd0] ss:$8 sps:$4 sm:$0xff]  }
 0x1f0   :  { %2396 = vmatpush1.bf16.msra.mxu0 %v4067_v55  ;;  %2560 = vmatpush1.bf16.msra.mxu1 %v4070_v33  ;;  %v4153_v55 = vld [vmem:[#allocation6 + $0xe4] ss:$8 sps:$4 sm:$0xff]   ;;  %v4151_v33 = vld [vmem:[#allocation6 + $0xe0] ss:$8 sps:$4 sm:$0xff]  }
 0x1f1   :  { %2397 = vmatprep.subr.bf16.mxu0 %v4075_v56  ;;  %2561 = vmatprep.subr.bf16.mxu1 %v4078_v57  ;;  %v4156_v56 = vld [vmem:[#allocation6 + $0xf4] ss:$8 sps:$4 sm:$0xff]   ;;  %v4154_v57 = vld [vmem:[#allocation6 + $0xf0] ss:$8 sps:$4 sm:$0xff]  }
 0x1f4   :  { %2398 = vmatpush1.bf16.msra.mxu0 %v4073_v58  ;;  %2562 = vmatpush1.bf16.msra.mxu1 %v4076_v59  ;;  %v4159_v58 = vld [vmem:[#allocation6 + $0x104] ss:$8 sps:$4 sm:$0xff]  }
 0x1f5   :  { %2399 = vmatprep.subr.bf16.mxu0 %v4081_v60  ;;  %2563 = vmatprep.subr.bf16.mxu1 %v4084_v61  ;;  %v4205_v59 = vld [vmem:[#allocation7 + $0x40] sm:$0xff]   ;;  %v4207_v61 = vld [vmem:[#allocation7 + $0x48] sm:$0xff]  }
 0x1f6   :  { %v4206_v60 = vld [vmem:[#allocation7] sm:$0xff]  }
 0x1f8   :  { %2400 = vmatpush1.bf16.msra.mxu0 %v4079_v62  ;;  %2564 = vmatpush1.bf16.msra.mxu1 %v4082_v63  ;;  %v4208_v62 = vld [vmem:[#allocation7 + $0x8] sm:$0xff]   ;;  %v4209_v63 = vld [vmem:[#allocation7 + $0x50] sm:$0xff]  }
 0x1f9   :  { %2401 = vmatprep.subr.bf16.mxu0 %v4087_v2  ;;  %2565 = vmatprep.subr.bf16.mxu1 %v4090_v3  ;;  %v4210_v2 = vld [vmem:[#allocation7 + $0x10] sm:$0xff]   ;;  %v4211_v3 = vld [vmem:[#allocation7 + $0x58] sm:$0xff]  }
 0x1fc   :  { %2402 = vmatpush1.bf16.msra.mxu0 %v4085_v4  ;;  %2566 = vmatpush1.bf16.msra.mxu1 %v4088_v5  ;;  %v4212_v4 = vld [vmem:[#allocation7 + $0x18] sm:$0xff]   ;;  %v4213_v5 = vld [vmem:[#allocation7 + $0x60] sm:$0xff]  }
 0x1fd   :  { %2403 = vmatprep.subr.bf16.mxu0 %v4093_v7  ;;  %2567 = vmatprep.subr.bf16.mxu1 %v4096_v8  ;;  %v4215_v7 = vld [vmem:[#allocation7 + $0x68] sm:$0xff]  }
 0x1fe   :  { %v4216_v8 = vld [vmem:[#allocation7 + $0x28] sm:$0xff]  }
 0x200   :  { %2404 = vmatpush1.bf16.msra.mxu0 %v4091_v12  ;;  %2568 = vmatpush1.bf16.msra.mxu1 %v4094_v32  ;;  %v4490_v12 = vld [vmem:[%s4520_s4] sm:$0xf] }
 0x201   :  { %2405 = vmatprep.subr.bf16.mxu0 %v4099_v14  ;;  %2569 = vmatprep.subr.bf16.mxu1 %v4102_v15  ;;  %v957_v32 = vrot.slane %v4490_v12, %v4442_v10  ;;  %v961_v13 = vrot.slane %v4490_v12, %v4450_v0  ;;  %v969_v14 = vrot.slane %v4490_v12, %v170_v49 }
 0x204   :  { %2406 = vmatpush1.bf16.msra.mxu0 %v4097_v16  ;;  %2570 = vmatpush1.bf16.msra.mxu1 %v4100_v17 }
 0x205   :  { %2407 = vmatprep.subr.bf16.mxu0 %v4105_v18  ;;  %2571 = vmatprep.subr.bf16.mxu1 %v4108_v19 }
 0x208   :  { %2408 = vmatpush1.bf16.msra.mxu0 %v4103_v20  ;;  %2572 = vmatpush1.bf16.msra.mxu1 %v4106_v21 }
 0x209   :  { %2986 = vmatprep.subr.bf16.mxu0 %v4111_v11  ;;  %3656 = vmatprep.subr.bf16.mxu1 %v4205_v59  ;;  %v965_v59 = vrot.slane %v4490_v12, %v166_v25  ;;  %v4220_v25 = vld [vmem:[#allocation7 + $0x38] sm:$0xff]  }
 0x20b   :  { %2410 = vmatmul.mubr.bf16.vlgmr.msra.gmra.mrb[4].mxu0 %v694_v24  ;;  %2574 = vmatmul.mubr.bf16.vlgmr.msra.gmra.mrb[12].mxu1 %v694_v24 }
 0x20c   :  { %2987 = vmatpush1.bf16.msra.mxu0 %v4109_v23  ;;  %3657 = vmatpush3.bf16.msra.mxu1 %v4206_v60  ;;  %v4201_v60 = vld [vmem:[#allocation6 + $0x1e4] ss:$8 sps:$4 sm:$0xff]  }
 0x20d   :  { %2988 = vmatprep.subr.bf16.mxu0 %v4114_v26  ;;  %3658 = vmatprep.subr.bf16.mxu1 %v4207_v61  ;;  %v4199_v61 = vld [vmem:[#allocation6 + $0x1e0] ss:$8 sps:$4 sm:$0xff]  }
 0x210   :  { %2989 = vmatpush1.bf16.msra.mxu0 %v4112_v45  ;;  %3659 = vmatpush3.bf16.msra.mxu1 %v4208_v62 }
 0x211   :  { %2990 = vmatprep.subr.bf16.mxu0 %v4117_v27  ;;  %3660 = vmatprep.subr.bf16.mxu1 %v4209_v63  ;;  %v4204_v63 = vld [vmem:[#allocation6 + $0x1f4] ss:$8 sps:$4 sm:$0xff]  }
 0x214   :  { %2991 = vmatpush1.bf16.msra.mxu0 %v4115_v28  ;;  %3661 = vmatpush3.bf16.msra.mxu1 %v4210_v2  ;;  %v4157_v28 = vld [vmem:[#allocation6 + $0x100] ss:$8 sps:$4 sm:$0xff]   ;;  %v4202_v2 = vld [vmem:[#allocation6 + $0x1f0] ss:$8 sps:$4 sm:$0xff]  }
 0x215   :  { %2992 = vmatprep.subr.bf16.mxu0 %v4120_v29  ;;  %3662 = vmatprep.subr.bf16.mxu1 %v4211_v3 }
 0x218   :  { %2993 = vmatpush1.bf16.msra.mxu0 %v4118_v30  ;;  %3663 = vmatpush3.bf16.msra.mxu1 %v4212_v4  ;;  %v4162_v30 = vld [vmem:[#allocation6 + $0x114] ss:$8 sps:$4 sm:$0xff]  }
 0x219   :  { %2994 = vmatprep.subr.bf16.mxu0 %v4123_v31  ;;  %3664 = vmatprep.subr.bf16.mxu1 %v4213_v5  ;;  %v4160_v31 = vld [vmem:[#allocation6 + $0x110] ss:$8 sps:$4 sm:$0xff]  }
 0x21a   :  { %v4217_v5 = vld [vmem:[#allocation7 + $0x70] sm:$0xff]  }
 0x21c   :  { %2995 = vmatpush1.bf16.msra.mxu0 %v4121_v34  ;;  %3665 = vmatpush3.bf16.msra.mxu1 %v4214_v6  ;;  %v4165_v34 = vld [vmem:[#allocation6 + $0x124] ss:$8 sps:$4 sm:$0xff]   ;;  %v4218_v6 = vld [vmem:[#allocation7 + $0x30] sm:$0xff]  }
 0x21d   :  { %2996 = vmatprep.subr.bf16.mxu0 %v4126_v35  ;;  %3666 = vmatprep.subr.bf16.mxu1 %v4215_v7  ;;  %v4163_v35 = vld [vmem:[#allocation6 + $0x120] ss:$8 sps:$4 sm:$0xff]  }
 0x21e   :  { %v2654_v7 = vld [vmem:[%s4522_s6] sm:$0x3] }
 0x21f   :  { %v2663_v12 = vrot.slane %v2654_v7, %v4450_v0 }
 0x220   :  { %2997 = vmatpush1.bf16.msra.mxu0 %v4124_v36  ;;  %3667 = vmatpush3.bf16.msra.mxu1 %v4216_v8  ;;  %v4168_v36 = vld [vmem:[#allocation6 + $0x134] ss:$8 sps:$4 sm:$0xff]   ;;  %v2659_v8 = vrot.slane %v2654_v7, %v4442_v10 }
 0x221   :  { %2998 = vmatprep.subr.bf16.mxu0 %v4129_v37  ;;  %v4166_v37 = vld [vmem:[#allocation6 + $0x130] ss:$8 sps:$4 sm:$0xff]   ;;  %3668 = vmatprep.subr.bf16.mxu1 %v4217_v5 }
 0x224   :  { %2999 = vmatpush1.bf16.msra.mxu0 %v4127_v38  ;;  %v4171_v38 = vld [vmem:[#allocation6 + $0x144] ss:$8 sps:$4 sm:$0xff]   ;;  %3669 = vmatpush3.bf16.msra.mxu1 %v4218_v6 }
 0x225   :  { %3000 = vmatprep.subr.bf16.mxu0 %v4132_v39  ;;  %v4169_v39 = vld [vmem:[#allocation6 + $0x140] ss:$8 sps:$4 sm:$0xff]   ;;  %3670 = vmatprep.subr.bf16.mxu1 %v4219_v9 }
 0x228   :  { %3001 = vmatpush1.bf16.msra.mxu0 %v4130_v40  ;;  %v4174_v40 = vld [vmem:[#allocation6 + $0x154] ss:$8 sps:$4 sm:$0xff]   ;;  %3671 = vmatpush3.bf16.msra.mxu1 %v4220_v25 }
 0x229   :  { %3002 = vmatprep.subr.bf16.mxu0 %v4135_v41  ;;  %v4172_v41 = vld [vmem:[#allocation6 + $0x150] ss:$8 sps:$4 sm:$0xff]  }
 0x22c   :  { %3003 = vmatpush1.bf16.msra.mxu0 %v4133_v42  ;;  %v4177_v42 = vld [vmem:[#allocation6 + $0x164] ss:$8 sps:$4 sm:$0xff]  }
 0x22d   :  { %3004 = vmatprep.subr.bf16.mxu0 %v4138_v43  ;;  %v4175_v43 = vld [vmem:[#allocation6 + $0x160] ss:$8 sps:$4 sm:$0xff]  }
 0x230   :  { %3005 = vmatpush1.bf16.msra.mxu0 %v4136_v44  ;;  %v4180_v44 = vld [vmem:[#allocation6 + $0x174] ss:$8 sps:$4 sm:$0xff]  }
 0x231   :  { %3006 = vmatprep.subr.bf16.mxu0 %v4141_v1  ;;  %v4178_v1 = vld [vmem:[#allocation6 + $0x170] ss:$8 sps:$4 sm:$0xff]  }
 0x234   :  { %3007 = vmatpush1.bf16.msra.mxu0 %v4139_v47  ;;  %v4183_v47 = vld [vmem:[#allocation6 + $0x184] ss:$8 sps:$4 sm:$0xff]  }
 0x235   :  { %3008 = vmatprep.subr.bf16.mxu0 %v4144_v48  ;;  %v4181_v48 = vld [vmem:[#allocation6 + $0x180] ss:$8 sps:$4 sm:$0xff]  }
 0x238   :  { %3009 = vmatpush1.bf16.msra.mxu0 %v4142_v50  ;;  %v4186_v50 = vld [vmem:[#allocation6 + $0x194] ss:$8 sps:$4 sm:$0xff]  }
 0x239   :  { %3010 = vmatprep.subr.bf16.mxu0 %v4147_v51  ;;  %v4184_v51 = vld [vmem:[#allocation6 + $0x190] ss:$8 sps:$4 sm:$0xff]  }
 0x23c   :  { %3011 = vmatpush1.bf16.msra.mxu0 %v4145_v52  ;;  %v4189_v52 = vld [vmem:[#allocation6 + $0x1a4] ss:$8 sps:$4 sm:$0xff]  }
 0x23d   :  { %3012 = vmatprep.subr.bf16.mxu0 %v4150_v53  ;;  %v4187_v53 = vld [vmem:[#allocation6 + $0x1a0] ss:$8 sps:$4 sm:$0xff]  }
 0x240   :  { %3013 = vmatpush1.bf16.msra.mxu0 %v4148_v54  ;;  %v4192_v54 = vld [vmem:[#allocation6 + $0x1b4] ss:$8 sps:$4 sm:$0xff]  }
 0x241   :  { %3014 = vmatprep.subr.bf16.mxu0 %v4153_v55  ;;  %v4190_v55 = vld [vmem:[#allocation6 + $0x1b0] ss:$8 sps:$4 sm:$0xff]  }
 0x244   :  { %3015 = vmatpush1.bf16.msra.mxu0 %v4151_v33  ;;  %v4195_v33 = vld [vmem:[#allocation6 + $0x1c4] ss:$8 sps:$4 sm:$0xff]  }
 0x245   :  { %3016 = vmatprep.subr.bf16.mxu0 %v4156_v56  ;;  %v4193_v56 = vld [vmem:[#allocation6 + $0x1c0] ss:$8 sps:$4 sm:$0xff]  }
 0x248   :  { %3017 = vmatpush1.bf16.msra.mxu0 %v4154_v57  ;;  %v4198_v57 = vld [vmem:[#allocation6 + $0x1d4] ss:$8 sps:$4 sm:$0xff]  }
 0x249   :  { %3027 = vmatprep.subr.bf16.mxu0 %v4159_v58  ;;  %v4196_v58 = vld [vmem:[#allocation6 + $0x1d0] ss:$8 sps:$4 sm:$0xff]  }
 0x2de   :  { %v2411_v15 = vpop.f32.mrb[4].mxu0  ;;  %v4499_v16 = vpop.f32.mrb[12].mxu1 }
 0x2df   :  { %v3678_v17 = vadd.f32 %v2411_v15, %v957_v32  ;;  %v2413_v46 = vpop.f32.mrb[5].mxu0  ;;  %v2577_v18 = vpop.f32.mrb[13].mxu1  ;;  %v3680_v62 = vadd.f32 %v4499_v16, %v965_v59 }
 0x2e0   :  { %v3679_v19 = vadd.f32 %v2413_v46, %v961_v13  ;;  %v3681_v20 = vadd.f32 %v2577_v18, %v969_v14  ;;  %v2415_v21 = vpop.f32.mrb[6].mxu0  ;;  %v2579_v22 = vpop.f32.mrb[14].mxu1 }
 0x2e1   :  { %v2582_v11 = vmax.f32 %v3678_v17, 0.0  ;;  %v2416_v23 = vpop.f32.mrb[7].mxu0  ;;  %v2580_v24 = vpop.f32.mrb[15].mxu1  ;;  %v2584_v3 = vmax.f32 %v3680_v62, 0.0  ;;  %v3639_v22 = vld [vmem:[%s4524_s8] ss:$0 sm:$0xff] }
 0x2e2   :  { %v2583_v26 = vmax.f32 %v3679_v19, 0.0  ;;  %v2585_v45 = vmax.f32 %v3681_v20, 0.0 }
 0x2e3   :  { %v2586_v29 = vpack.c.bf16 %v2582_v11, %v2582_v11  ;;  %v2588_v4 = vpack.c.bf16 %v2584_v3, %v2584_v3 }
 0x2e4   :  { %v2587_v27 = vpack.c.bf16 %v2583_v26, %v2583_v26  ;;  %v2589_v49 = vpack.c.bf16 %v2585_v45, %v2585_v45 }
 0x2e6   :  { %3018 = vmatprep.mubr.bf16.mxu0 %v2587_v27 }
 0x2e7   :  { %3019 = vmatmul.mubr.bf16.vlgmr.msra.gmra.mrb[8].mxu0 %v2586_v29 }
 0x2e8   :  { %3028 = vmatpush1.bf16.msra.mxu0 %v4157_v28  ;;  %3059 = vmatprep.mubr.bf16.mxu0 %v2589_v49 }
 0x2e9   :  { %3029 = vmatprep.subr.bf16.mxu0 %v4162_v30 }
 0x2ec   :  { %3030 = vmatpush1.bf16.msra.mxu0 %v4160_v31 }
 0x2ed   :  { %3031 = vmatprep.subr.bf16.mxu0 %v4165_v34 }
 0x2f0   :  { %3032 = vmatpush1.bf16.msra.mxu0 %v4163_v35 }
 0x2f1   :  { %3033 = vmatprep.subr.bf16.mxu0 %v4168_v36 }
 0x2f4   :  { %3034 = vmatpush1.bf16.msra.mxu0 %v4166_v37 }
 0x2f5   :  { %3035 = vmatprep.subr.bf16.mxu0 %v4171_v38 }
 0x2f8   :  { %3036 = vmatpush1.bf16.msra.mxu0 %v4169_v39 }
 0x2f9   :  { %3037 = vmatprep.subr.bf16.mxu0 %v4174_v40 }
 0x2fc   :  { %3038 = vmatpush1.bf16.msra.mxu0 %v4172_v41 }
 0x2fd   :  { %3039 = vmatprep.subr.bf16.mxu0 %v4177_v42 }
 0x300   :  { %3040 = vmatpush1.bf16.msra.mxu0 %v4175_v43 }
 0x301   :  { %3041 = vmatprep.subr.bf16.mxu0 %v4180_v44 }
 0x304   :  { %3042 = vmatpush1.bf16.msra.mxu0 %v4178_v1 }
 0x305   :  { %3043 = vmatprep.subr.bf16.mxu0 %v4183_v47 }
 0x308   :  { %3044 = vmatpush1.bf16.msra.mxu0 %v4181_v48 }
 0x309   :  { %3045 = vmatprep.subr.bf16.mxu0 %v4186_v50 }
 0x30c   :  { %3046 = vmatpush1.bf16.msra.mxu0 %v4184_v51 }
 0x30d   :  { %3047 = vmatprep.subr.bf16.mxu0 %v4189_v52 }
 0x310   :  { %3048 = vmatpush1.bf16.msra.mxu0 %v4187_v53 }
 0x311   :  { %3049 = vmatprep.subr.bf16.mxu0 %v4192_v54 }
 0x314   :  { %3050 = vmatpush1.bf16.msra.mxu0 %v4190_v55 }
 0x315   :  { %3051 = vmatprep.subr.bf16.mxu0 %v4195_v33 }
 0x318   :  { %3052 = vmatpush1.bf16.msra.mxu0 %v4193_v56 }
 0x319   :  { %3053 = vmatprep.subr.bf16.mxu0 %v4198_v57 }
 0x31c   :  { %3054 = vmatpush1.bf16.msra.mxu0 %v4196_v58 }
 0x31d   :  { %3055 = vmatprep.subr.bf16.mxu0 %v4201_v60 }
 0x320   :  { %3056 = vmatpush1.bf16.msra.mxu0 %v4199_v61 }
 0x321   :  { %3057 = vmatprep.subr.bf16.mxu0 %v4204_v63 }
 0x324   :  { %3058 = vmatpush1.bf16.msra.mxu0 %v4202_v2 }
 0x327   :  { %3060 = vmatmul.mubr.bf16.vlgmr.msra.gmra.mrb[8].mxu0 %v2588_v4 }
 0x3fa   :  { %v3061_v32 = vpop.f32.mrb[8].mxu0 }
 0x3fb   :  { %v3682_v13 = vadd.f32 %v3061_v32, %v2659_v8  ;;  %v3063_v14 = vpop.f32.mrb[9].mxu0 }
 0x3fc   :  { %v3683_v15 = vadd.f32 %v3063_v14, %v2663_v12  ;;  %v3065_v16 = vpop.f32.mrb[10].mxu0 }
 0x3fd   :  { %v3068_v17 = vmax.f32 %v3682_v13, 0.0  ;;  %v3066_v46 = vpop.f32.mrb[11].mxu0 }
 0x3fe   :  { %v3069_v18 = vmax.f32 %v3683_v15, 0.0 }
 0x3ff   :  { %v3070_v20 = vpack.c.bf16 %v3068_v17, %v3068_v17 }
 0x400   :  { %v3071_v19 = vpack.c.bf16 %v3069_v18, %v3069_v18 }
 0x402   :  { %3239 = vmatprep.mubr.bf16.mxu1 %v3071_v19 }
 0x403   :  { %3240 = vmatmul.mubr.bf16.vlgmr.msra.gmra.mrb[16].mxu1 %v3070_v20 }
 0x4d6   :  { %v3672_v21 = vpop.f32.mrb[16].mxu1 }
 0x4d7   :  { %v3673_v10 = vpop.f32.mrb[17].mxu1 }
 0x4d8   :  { %v3674_v11 = vadd.f32 %v3673_v10, %v3672_v21  ;;  %v3675_v0 = vpop.f32.mrb[18].mxu1 }
 0x4d9   :  { %v3676_v23 = vpop.f32.mrb[19].mxu1 }
 0x4da   :  { %v3242_v24 = vadd.f32 %v3674_v11, %v3639_v22 }
 0x4dc   :  { %3247 = vst [vmem:[%s4525_s9] sm:$0xff] %v3242_v24 }
 0x4dd   :  { %3252 = vsyncpa [#allocation3], 1 }
 0x4de   :  { %3253 = vsyncpa [#allocation5], 1 }
 0x4df   :  { %3254 = vsyncpa [#allocation8], 1 }

</bundles_post_ra>
